<compile_context>
chip_gen: v5e
topology: v5e:2x2
jax: 0.10.0
libtpu: 0.0.40
codegen_flags: <defaults>
</compile_context>

<pallas_src>
import functools
import math

import jax
import jax.numpy as jnp
from jax.experimental import pallas as pl
from jax.experimental.pallas import tpu as pltpu


def modal_fusion_kernel(x_ref, y_ref, w1_ref, b1_ref, wd_ref, bd_ref,
                        w3_ref, b3_ref, o_ref, pad_ref, *, task_is_seg):
    """One batch element per grid step.

    x_ref, y_ref, o_ref : (1, H, W, C)  NHWC tiles (IO dtype: f32 or bf16)
    w1_ref              : (2C, C)       fused 1x1 conv over concat(x, y)
    b1_ref              : (1, C)        f32
    wd_ref              : (9, C)        depthwise 3x3 taps, flattened (f32)
    bd_ref              : (1, C)        depthwise bias (f32)
    w3_ref              : (C, C)        final 1x1 conv, pre-scaled by folded BN
    b3_ref              : (1, C)        folded  b3*scale + shift  (f32)
    pad_ref             : VMEM scratch (H+2, W+2, C) f32, zero-padded depthwise input
    """
    _, H, W, C = x_ref.shape
    x = x_ref[0]                       # (H, W, C)
    y = y_ref[0]                       # (H, W, C)

    # --- 1x1 conv over concat(x, y): a single MXU dot with K = 2C ---
    xy = jnp.concatenate([x.reshape(H * W, C), y.reshape(H * W, C)], axis=-1)
    h = jnp.dot(xy.astype(w1_ref.dtype), w1_ref[...],
                preferred_element_type=jnp.float32) + b1_ref[...]

    # --- depthwise 3x3 conv, padding=1, via zero-padded VMEM scratch ---
    # Full zero + interior overwrite keeps the kernel state-free across grid
    # steps (safe under "parallel" megacore sharding) and is still far cheaper
    # than the previous concat-based padding (two full-tile copies).
    pad_ref[...] = jnp.zeros_like(pad_ref)
    pad_ref[1:H + 1, 1:W + 1, :] = h.reshape(H, W, C)

    wd = wd_ref[...]                                   # (9, C), loaded once
    acc = jnp.broadcast_to(bd_ref[...], (H, W, C))     # bias folded into init
    for k in range(9):
        di, dj = k // 3, k % 3
        acc = acc + pad_ref[di:di + H, dj:dj + W, :] * wd[k:k + 1, :]
    acc = jnp.maximum(acc, 0.0)                        # ReLU

    # --- final 1x1 conv with eval-mode BatchNorm folded into (w3, b3) ---
    h3 = jnp.dot(acc.reshape(H * W, C).astype(w3_ref.dtype), w3_ref[...],
                 preferred_element_type=jnp.float32) + b3_ref[...]
    h3 = h3.reshape(H, W, C)

    # --- residual add: 'seg' -> x + out, 'motion' -> y + out ---
    res = x if task_is_seg else y
    o_ref[0] = (res.astype(jnp.float32) + h3).astype(o_ref.dtype)


def _fold_params(params, compute_dtype):
    """Fold eval-mode BatchNorm into the final 1x1 conv, flatten the depthwise
    taps, and cast matmul weights to the requested compute dtype."""
    C = params["w3"].shape[1]
    scale = params["scale"].astype(jnp.float32)
    shift = params["shift"].astype(jnp.float32)
    w3_eff = params["w3"].astype(jnp.float32) * scale[None, :]
    b3_eff = params["b3"].astype(jnp.float32) * scale + shift
    return (
        params["w1"].astype(compute_dtype),                     # (2C, C)
        params["b1"].reshape(1, C).astype(jnp.float32),
        params["wd"].reshape(9, C).astype(jnp.float32),
        params["bd"].reshape(1, C).astype(jnp.float32),
        w3_eff.astype(compute_dtype),                           # (C, C)
        b3_eff.reshape(1, C),
    )


def modal_fusion(x_nhwc, y_nhwc, params, task, compute_dtype=jnp.float32):
    """Pallas-backed ModalFusion forward (method='concat'), NHWC end-to-end.

    compute_dtype: dtype of the MXU matmul operands. Use float32 everywhere,
    or bfloat16 on v6e/v7x (accumulation is always float32). Passing bf16
    activations additionally halves the HBM traffic (recommended on v5e).
    """
    assert task in ("seg", "motion")
    N, H, W, C = x_nhwc.shape
    w1, b1, wd, bd, w3, b3 = _fold_params(params, compute_dtype)

    kernel = functools.partial(modal_fusion_kernel, task_is_seg=(task == "seg"))

    full = lambda shape: pl.BlockSpec(shape, lambda b: (0,) * len(shape))
    grid_spec = pltpu.PrefetchScalarGridSpec(
        num_scalar_prefetch=0,
        grid=(N,),
        in_specs=[
            pl.BlockSpec((1, H, W, C), lambda b: (b, 0, 0, 0)),   # x
            pl.BlockSpec((1, H, W, C), lambda b: (b, 0, 0, 0)),   # y
            full((2 * C, C)),    # w1 (fused concat weight)
            full((1, C)),        # b1
            full((9, C)),        # wd (flattened 3x3 taps)
            full((1, C)),        # bd
            full((C, C)),        # w3 (BN-folded)
            full((1, C)),        # b3 (BN-folded)
        ],
        out_specs=pl.BlockSpec((1, H, W, C), lambda b: (b, 0, 0, 0)),
        scratch_shapes=[pltpu.VMEM((H + 2, W + 2, C), jnp.float32)],
    )

    itemsize = jnp.dtype(x_nhwc.dtype).itemsize
    vmem_limit = int(min(
        64 * 2**20,
        max(32 * 2**20,
            10 * H * W * C * max(itemsize, 4) + 2 * (H + 2) * (W + 2) * C * 4)))

    return pl.pallas_call(
        kernel,
        out_shape=jax.ShapeDtypeStruct((N, H, W, C), x_nhwc.dtype),
        grid_spec=grid_spec,
        compiler_params=pltpu.CompilerParams(
            dimension_semantics=("parallel",),
            vmem_limit_bytes=vmem_limit),
    )(x_nhwc, y_nhwc, w1, b1, wd, bd, w3, b3)


def modal_fusion_nchw(x_nchw, y_nchw, params, task, compute_dtype=jnp.float32):
    """NCHW wrapper matching the PyTorch interface.

    Prefer the NHWC entry point end-to-end: these transposes are full HBM
    read+write passes and roughly double memory traffic for a memory-bound op.
    """
    x = jnp.transpose(x_nchw, (0, 2, 3, 1))
    y = jnp.transpose(y_nchw, (0, 2, 3, 1))
    out = modal_fusion(x, y, params, task, compute_dtype)
    return jnp.transpose(out, (0, 3, 1, 2))


def init_modal_fusion_params(key, in_c, reduction=1, dtype=jnp.float32):
    """Deterministic init mirroring ModalFusion._init_weights (conv:
    N(0, sqrt(2/fan_out)), bias=0; BN: gamma=1, beta=0, running stats 0/1,
    eval mode)."""
    out_c = in_c // 2
    cm = out_c // reduction
    assert cm == out_c, "reduction=1 assumed (as in RMS)"
    C = out_c
    k1, k2, k3 = jax.random.split(key, 3)
    std1 = math.sqrt(2.0 / (1 * 1 * cm))          # conv 1x1: fan_out = cm
    stdd = math.sqrt(2.0 / (3 * 3 * cm / cm))     # depthwise: fan_out = 9
    std3 = math.sqrt(2.0 / (1 * 1 * out_c))       # conv 1x1: fan_out = out_c
    eps = 1e-5
    gamma = jnp.ones((C,), dtype)
    beta = jnp.zeros((C,), dtype)
    running_mean = jnp.zeros((C,), dtype)
    running_var = jnp.ones((C,), dtype)
    scale = gamma / jnp.sqrt(running_var + eps)
    shift = beta - running_mean * scale
    return {
        "w1": jax.random.normal(k1, (in_c, cm), dtype) * std1,
        "b1": jnp.zeros((cm,), dtype),
        "wd": jax.random.normal(k2, (3, 3, cm), dtype) * stdd,
        "bd": jnp.zeros((cm,), dtype),
        "w3": jax.random.normal(k3, (cm, out_c), dtype) * std3,
        "b3": jnp.zeros((out_c,), dtype),
        "scale": scale,
        "shift": shift,
    }


def modal_fusion_ref(x, y, p, task):
    """Pure-JAX NHWC reference with UNfolded BatchNorm (validates the BN fold)."""
    N, H, W, C = x.shape
    xy = jnp.concatenate([x, y], axis=-1)
    h = jnp.einsum("nhwc,cd->nhwd", xy, p["w1"]) + p["b1"]
    hp = jnp.pad(h, ((0, 0), (1, 1), (1, 1), (0, 0)))
    acc = jnp.zeros_like(h)
    for di in range(3):
        for dj in range(3):
            acc = acc + hp[:, di:di + H, dj:dj + W, :] * p["wd"][di, dj]
    acc = jnp.maximum(acc + p["bd"], 0.0)
    h3 = jnp.einsum("nhwc,cd->nhwd", acc, p["w3"]) + p["b3"]
    h3 = h3 * p["scale"] + p["shift"]
    res = x if task == "seg" else y
    return res + h3


if __name__ == "__main__":
    key = jax.random.PRNGKey(0)
    kx, ky, kp = jax.random.split(key, 3)

    # Small NHWC feature maps standing in for the encoder outputs f1[i] / f2[i].
    N, H, W, C = 2, 16, 16, 4
    x = jax.random.normal(kx, (N, H, W, C), jnp.float32)
    y = jax.random.normal(ky, (N, H, W, C), jnp.float32)

    params = init_modal_fusion_params(kp, in_c=2 * C)

    # RMS uses the same ModalFusion with task='seg' (fv) and task='motion' (fg).
    out_seg = modal_fusion(x, y, params, "seg")
    out_motion = modal_fusion(x, y, params, "motion")
    jax.block_until_ready((out_seg, out_motion))

    ref_seg = modal_fusion_ref(x, y, params, "seg")
    ref_motion = modal_fusion_ref(x, y, params, "motion")

    assert out_seg.shape == (N, H, W, C)
    assert out_motion.shape == (N, H, W, C)
    assert jnp.allclose(out_seg, ref_seg, atol=1e-5, rtol=1e-5)
    assert jnp.allclose(out_motion, ref_motion, atol=1e-5, rtol=1e-5)

    # bf16 I/O + bf16 MXU operands (recommended on v6e/v7x; bf16 I/O on v5e).
    out_seg_bf16 = modal_fusion(x.astype(jnp.bfloat16), y.astype(jnp.bfloat16),
                                params, "seg", compute_dtype=jnp.bfloat16)
    jax.block_until_ready(out_seg_bf16)
    assert out_seg_bf16.shape == (N, H, W, C)
    assert out_seg_bf16.dtype == jnp.bfloat16
    assert jnp.allclose(out_seg_bf16.astype(jnp.float32), ref_seg,
                        atol=1e-1, rtol=1e-1)

    print("KERNEL_OK")
</pallas_src>

<mosaic_0001>
module attributes {stable_mosaic.version = 11 : i64} {
  func.func @modal_fusion_kernel(%arg0: i32, %arg1: memref<1x16x16x4xf32, #tpu.memory_space<vmem>>, %arg2: memref<1x16x16x4xf32, #tpu.memory_space<vmem>>, %arg3: memref<8x4xf32, #tpu.memory_space<vmem>>, %arg4: memref<1x4xf32, #tpu.memory_space<vmem>>, %arg5: memref<9x4xf32, #tpu.memory_space<vmem>>, %arg6: memref<1x4xf32, #tpu.memory_space<vmem>>, %arg7: memref<4x4xf32, #tpu.memory_space<vmem>>, %arg8: memref<1x4xf32, #tpu.memory_space<vmem>>, %arg9: memref<1x16x16x4xf32, #tpu.memory_space<vmem>>, %arg10: memref<18x18x4xf32, #tpu.memory_space<vmem>>) attributes {dimension_semantics = [#tpu.dimension_semantics<parallel>], iteration_bounds = array<i64: 2>, scalar_prefetch = 0 : i64, scratch_operands = 1 : i64, tpu.core_type = #tpu.core_type<tc>, window_params = [{transform_indices = @transform_0, window_bounds = array<i64: 1, 16, 16, 4>}, {transform_indices = @transform_1, window_bounds = array<i64: 1, 16, 16, 4>}, {pipeline_mode = #tpu.pipeline_mode<synchronous>, transform_indices = @transform_2, window_bounds = array<i64: 8, 4>}, {pipeline_mode = #tpu.pipeline_mode<synchronous>, transform_indices = @transform_3, window_bounds = array<i64: 1, 4>}, {pipeline_mode = #tpu.pipeline_mode<synchronous>, transform_indices = @transform_4, window_bounds = array<i64: 9, 4>}, {pipeline_mode = #tpu.pipeline_mode<synchronous>, transform_indices = @transform_5, window_bounds = array<i64: 1, 4>}, {pipeline_mode = #tpu.pipeline_mode<synchronous>, transform_indices = @transform_6, window_bounds = array<i64: 4, 4>}, {pipeline_mode = #tpu.pipeline_mode<synchronous>, transform_indices = @transform_7, window_bounds = array<i64: 1, 4>}, {transform_indices = @transform_8, window_bounds = array<i64: 1, 16, 16, 4>}]} {
    %c0 = arith.constant 0 : index
    %c0_0 = arith.constant 0 : index
    %c0_1 = arith.constant 0 : index
    %c0_2 = arith.constant 0 : index
    %0 = vector.load %arg1[%c0, %c0_0, %c0_1, %c0_2] : memref<1x16x16x4xf32, #tpu.memory_space<vmem>>, vector<1x16x16x4xf32>
    %1 = vector.shape_cast %0 : vector<1x16x16x4xf32> to vector<16x16x4xf32>
    %c0_3 = arith.constant 0 : index
    %c0_4 = arith.constant 0 : index
    %c0_5 = arith.constant 0 : index
    %c0_6 = arith.constant 0 : index
    %2 = vector.load %arg2[%c0_3, %c0_4, %c0_5, %c0_6] : memref<1x16x16x4xf32, #tpu.memory_space<vmem>>, vector<1x16x16x4xf32>
    %3 = vector.shape_cast %2 : vector<1x16x16x4xf32> to vector<16x16x4xf32>
    %4 = vector.shape_cast %1 : vector<16x16x4xf32> to vector<256x4xf32>
    %5 = vector.shape_cast %3 : vector<16x16x4xf32> to vector<256x4xf32>
    %6 = tpu.concatenate %4, %5 in 1 : vector<256x4xf32>, vector<256x4xf32> -> vector<256x8xf32>
    %c0_7 = arith.constant 0 : index
    %c0_8 = arith.constant 0 : index
    %7 = vector.load %arg3[%c0_7, %c0_8] : memref<8x4xf32, #tpu.memory_space<vmem>>, vector<8x4xf32>
    %cst = arith.constant dense<0.000000e+00> : vector<256x4xf32>
    %8 = tpu.matmul %6, %7, %cst {dimension_numbers = #tpu.dot_dimension_numbers<[1], [0], [0], [1], [0, 0, 1, 1], [], []>} : vector<256x8xf32>, vector<8x4xf32>, vector<256x4xf32> -> vector<256x4xf32>
    %c0_9 = arith.constant 0 : index
    %c0_10 = arith.constant 0 : index
    %9 = vector.load %arg4[%c0_9, %c0_10] : memref<1x4xf32, #tpu.memory_space<vmem>>, vector<1x4xf32>
    %10 = vector.broadcast %9 : vector<1x4xf32> to vector<256x4xf32>
    %11 = arith.addf %8, %10 : vector<256x4xf32>
    %cst_11 = arith.constant 0.000000e+00 : f32
    %12 = vector.broadcast %cst_11 : f32 to vector<18x18x4xf32>
    %c0_12 = arith.constant 0 : index
    %c0_13 = arith.constant 0 : index
    %c0_14 = arith.constant 0 : index
    %13 = vector.load %arg10[%c0_12, %c0_13, %c0_14] : memref<18x18x4xf32, #tpu.memory_space<vmem>>, vector<18x18x4xf32>
    tpu.vector_store %arg10[%c0_12, %c0_13, %c0_14], %12 {strides = array<i32>} : memref<18x18x4xf32, #tpu.memory_space<vmem>>, vector<18x18x4xf32>,
    %14 = vector.shape_cast %11 : vector<256x4xf32> to vector<16x16x4xf32>
    %c1 = arith.constant 1 : index
    %c1_15 = arith.constant 1 : index
    %c0_16 = arith.constant 0 : index
    %15 = vector.load %arg10[%c1, %c1_15, %c0_16] : memref<18x18x4xf32, #tpu.memory_space<vmem>>, vector<16x16x4xf32>
    tpu.vector_store %arg10[%c1, %c1_15, %c0_16], %14 {strides = array<i32>} : memref<18x18x4xf32, #tpu.memory_space<vmem>>, vector<16x16x4xf32>,
    %c0_17 = arith.constant 0 : index
    %c0_18 = arith.constant 0 : index
    %16 = vector.load %arg5[%c0_17, %c0_18] : memref<9x4xf32, #tpu.memory_space<vmem>>, vector<9x4xf32>
    %c0_19 = arith.constant 0 : index
    %c0_20 = arith.constant 0 : index
    %17 = vector.load %arg6[%c0_19, %c0_20] : memref<1x4xf32, #tpu.memory_space<vmem>>, vector<1x4xf32>
    %18 = vector.shape_cast %17 : vector<1x4xf32> to vector<1x1x4xf32>
    %19 = vector.broadcast %18 : vector<1x1x4xf32> to vector<16x16x4xf32>
    %c0_21 = arith.constant 0 : index
    %c0_22 = arith.constant 0 : index
    %c0_23 = arith.constant 0 : index
    %20 = vector.load %arg10[%c0_21, %c0_22, %c0_23] : memref<18x18x4xf32, #tpu.memory_space<vmem>>, vector<16x16x4xf32>
    %21 = vector.extract_strided_slice %16 {offsets = [0, 0], sizes = [1, 4], strides = [1, 1]} : vector<9x4xf32> to vector<1x4xf32>
    %22 = vector.shape_cast %21 : vector<1x4xf32> to vector<1x1x4xf32>
    %23 = vector.broadcast %22 : vector<1x1x4xf32> to vector<16x16x4xf32>
    %24 = arith.mulf %20, %23 : vector<16x16x4xf32>
    %25 = arith.addf %19, %24 : vector<16x16x4xf32>
    %c0_24 = arith.constant 0 : index
    %c1_25 = arith.constant 1 : index
    %c0_26 = arith.constant 0 : index
    %26 = vector.load %arg10[%c0_24, %c1_25, %c0_26] : memref<18x18x4xf32, #tpu.memory_space<vmem>>, vector<16x16x4xf32>
    %27 = vector.extract_strided_slice %16 {offsets = [1, 0], sizes = [1, 4], strides = [1, 1]} : vector<9x4xf32> to vector<1x4xf32>
    %28 = vector.shape_cast %27 : vector<1x4xf32> to vector<1x1x4xf32>
    %29 = vector.broadcast %28 : vector<1x1x4xf32> to vector<16x16x4xf32>
    %30 = arith.mulf %26, %29 : vector<16x16x4xf32>
    %31 = arith.addf %25, %30 : vector<16x16x4xf32>
    %c0_27 = arith.constant 0 : index
    %c2 = arith.constant 2 : index
    %c0_28 = arith.constant 0 : index
    %32 = vector.load %arg10[%c0_27, %c2, %c0_28] : memref<18x18x4xf32, #tpu.memory_space<vmem>>, vector<16x16x4xf32>
    %33 = vector.extract_strided_slice %16 {offsets = [2, 0], sizes = [1, 4], strides = [1, 1]} : vector<9x4xf32> to vector<1x4xf32>
    %34 = vector.shape_cast %33 : vector<1x4xf32> to vector<1x1x4xf32>
    %35 = vector.broadcast %34 : vector<1x1x4xf32> to vector<16x16x4xf32>
    %36 = arith.mulf %32, %35 : vector<16x16x4xf32>
    %37 = arith.addf %31, %36 : vector<16x16x4xf32>
    %c1_29 = arith.constant 1 : index
    %c0_30 = arith.constant 0 : index
    %c0_31 = arith.constant 0 : index
    %38 = vector.load %arg10[%c1_29, %c0_30, %c0_31] : memref<18x18x4xf32, #tpu.memory_space<vmem>>, vector<16x16x4xf32>
    %39 = vector.extract_strided_slice %16 {offsets = [3, 0], sizes = [1, 4], strides = [1, 1]} : vector<9x4xf32> to vector<1x4xf32>
    %40 = vector.shape_cast %39 : vector<1x4xf32> to vector<1x1x4xf32>
    %41 = vector.broadcast %40 : vector<1x1x4xf32> to vector<16x16x4xf32>
    %42 = arith.mulf %38, %41 : vector<16x16x4xf32>
    %43 = arith.addf %37, %42 : vector<16x16x4xf32>
    %c1_32 = arith.constant 1 : index
    %c1_33 = arith.constant 1 : index
    %c0_34 = arith.constant 0 : index
    %44 = vector.load %arg10[%c1_32, %c1_33, %c0_34] : memref<18x18x4xf32, #tpu.memory_space<vmem>>, vector<16x16x4xf32>
    %45 = vector.extract_strided_slice %16 {offsets = [4, 0], sizes = [1, 4], strides = [1, 1]} : vector<9x4xf32> to vector<1x4xf32>
    %46 = vector.shape_cast %45 : vector<1x4xf32> to vector<1x1x4xf32>
    %47 = vector.broadcast %46 : vector<1x1x4xf32> to vector<16x16x4xf32>
    %48 = arith.mulf %44, %47 : vector<16x16x4xf32>
    %49 = arith.addf %43, %48 : vector<16x16x4xf32>
    %c1_35 = arith.constant 1 : index
    %c2_36 = arith.constant 2 : index
    %c0_37 = arith.constant 0 : index
    %50 = vector.load %arg10[%c1_35, %c2_36, %c0_37] : memref<18x18x4xf32, #tpu.memory_space<vmem>>, vector<16x16x4xf32>
    %51 = vector.extract_strided_slice %16 {offsets = [5, 0], sizes = [1, 4], strides = [1, 1]} : vector<9x4xf32> to vector<1x4xf32>
    %52 = vector.shape_cast %51 : vector<1x4xf32> to vector<1x1x4xf32>
    %53 = vector.broadcast %52 : vector<1x1x4xf32> to vector<16x16x4xf32>
    %54 = arith.mulf %50, %53 : vector<16x16x4xf32>
    %55 = arith.addf %49, %54 : vector<16x16x4xf32>
    %c2_38 = arith.constant 2 : index
    %c0_39 = arith.constant 0 : index
    %c0_40 = arith.constant 0 : index
    %56 = vector.load %arg10[%c2_38, %c0_39, %c0_40] : memref<18x18x4xf32, #tpu.memory_space<vmem>>, vector<16x16x4xf32>
    %57 = vector.extract_strided_slice %16 {offsets = [6, 0], sizes = [1, 4], strides = [1, 1]} : vector<9x4xf32> to vector<1x4xf32>
    %58 = vector.shape_cast %57 : vector<1x4xf32> to vector<1x1x4xf32>
    %59 = vector.broadcast %58 : vector<1x1x4xf32> to vector<16x16x4xf32>
    %60 = arith.mulf %56, %59 : vector<16x16x4xf32>
    %61 = arith.addf %55, %60 : vector<16x16x4xf32>
    %c2_41 = arith.constant 2 : index
    %c1_42 = arith.constant 1 : index
    %c0_43 = arith.constant 0 : index
    %62 = vector.load %arg10[%c2_41, %c1_42, %c0_43] : memref<18x18x4xf32, #tpu.memory_space<vmem>>, vector<16x16x4xf32>
    %63 = vector.extract_strided_slice %16 {offsets = [7, 0], sizes = [1, 4], strides = [1, 1]} : vector<9x4xf32> to vector<1x4xf32>
    %64 = vector.shape_cast %63 : vector<1x4xf32> to vector<1x1x4xf32>
    %65 = vector.broadcast %64 : vector<1x1x4xf32> to vector<16x16x4xf32>
    %66 = arith.mulf %62, %65 : vector<16x16x4xf32>
    %67 = arith.addf %61, %66 : vector<16x16x4xf32>
    %c2_44 = arith.constant 2 : index
    %c2_45 = arith.constant 2 : index
    %c0_46 = arith.constant 0 : index
    %68 = vector.load %arg10[%c2_44, %c2_45, %c0_46] : memref<18x18x4xf32, #tpu.memory_space<vmem>>, vector<16x16x4xf32>
    %69 = vector.extract_strided_slice %16 {offsets = [8, 0], sizes = [1, 4], strides = [1, 1]} : vector<9x4xf32> to vector<1x4xf32>
    %70 = vector.shape_cast %69 : vector<1x4xf32> to vector<1x1x4xf32>
    %71 = vector.broadcast %70 : vector<1x1x4xf32> to vector<16x16x4xf32>
    %72 = arith.mulf %68, %71 : vector<16x16x4xf32>
    %73 = arith.addf %67, %72 : vector<16x16x4xf32>
    %cst_47 = arith.constant 0.000000e+00 : f32
    %74 = vector.broadcast %cst_47 : f32 to vector<16x16x4xf32>
    %75 = arith.maximumf %73, %74 : vector<16x16x4xf32>
    %76 = vector.shape_cast %75 : vector<16x16x4xf32> to vector<256x4xf32>
    %c0_48 = arith.constant 0 : index
    %c0_49 = arith.constant 0 : index
    %77 = vector.load %arg7[%c0_48, %c0_49] : memref<4x4xf32, #tpu.memory_space<vmem>>, vector<4x4xf32>
    %cst_50 = arith.constant dense<0.000000e+00> : vector<256x4xf32>
    %78 = tpu.matmul %76, %77, %cst_50 {dimension_numbers = #tpu.dot_dimension_numbers<[1], [0], [0], [1], [0, 0, 1, 1], [], []>} : vector<256x4xf32>, vector<4x4xf32>, vector<256x4xf32> -> vector<256x4xf32>
    %c0_51 = arith.constant 0 : index
    %c0_52 = arith.constant 0 : index
    %79 = vector.load %arg8[%c0_51, %c0_52] : memref<1x4xf32, #tpu.memory_space<vmem>>, vector<1x4xf32>
    %80 = vector.broadcast %79 : vector<1x4xf32> to vector<256x4xf32>
    %81 = arith.addf %78, %80 : vector<256x4xf32>
    %82 = vector.shape_cast %81 : vector<256x4xf32> to vector<16x16x4xf32>
    %83 = arith.addf %1, %82 : vector<16x16x4xf32>
    %c0_53 = arith.constant 0 : index
    %c0_54 = arith.constant 0 : index
    %c0_55 = arith.constant 0 : index
    %c0_56 = arith.constant 0 : index
    %84 = vector.load %arg9[%c0_53, %c0_54, %c0_55, %c0_56] : memref<1x16x16x4xf32, #tpu.memory_space<vmem>>, vector<1x16x16x4xf32>
    %85 = vector.shape_cast %84 : vector<1x16x16x4xf32> to vector<16x16x4xf32>
    %86 = vector.shape_cast %83 : vector<16x16x4xf32> to vector<1x16x16x4xf32>
    tpu.vector_store %arg9[%c0_53, %c0_54, %c0_55, %c0_56], %86 {strides = array<i32>} : memref<1x16x16x4xf32, #tpu.memory_space<vmem>>, vector<1x16x16x4xf32>,
    return
  }
  func.func @transform_0(%arg0: i32) -> (i32, i32, i32, i32) {
    %c0_i32 = arith.constant 0 : i32
    %c0_i32_0 = arith.constant 0 : i32
    %c0_i32_1 = arith.constant 0 : i32
    %c0_i32_2 = arith.constant 0 : i32
    return %arg0, %c0_i32, %c0_i32_0, %c0_i32_1 : i32, i32, i32, i32
  }
  func.func @transform_1(%arg0: i32) -> (i32, i32, i32, i32) {
    %c0_i32 = arith.constant 0 : i32
    %c0_i32_0 = arith.constant 0 : i32
    %c0_i32_1 = arith.constant 0 : i32
    %c0_i32_2 = arith.constant 0 : i32
    return %arg0, %c0_i32, %c0_i32_0, %c0_i32_1 : i32, i32, i32, i32
  }
  func.func @transform_2(%arg0: i32) -> (i32, i32) {
    %c0_i32 = arith.constant 0 : i32
    %c0_i32_0 = arith.constant 0 : i32
    %c0_i32_1 = arith.constant 0 : i32
    return %c0_i32, %c0_i32_0 : i32, i32
  }
  func.func @transform_3(%arg0: i32) -> (i32, i32) {
    %c0_i32 = arith.constant 0 : i32
    %c0_i32_0 = arith.constant 0 : i32
    %c0_i32_1 = arith.constant 0 : i32
    return %c0_i32, %c0_i32_0 : i32, i32
  }
  func.func @transform_4(%arg0: i32) -> (i32, i32) {
    %c0_i32 = arith.constant 0 : i32
    %c0_i32_0 = arith.constant 0 : i32
    %c0_i32_1 = arith.constant 0 : i32
    return %c0_i32, %c0_i32_0 : i32, i32
  }
  func.func @transform_5(%arg0: i32) -> (i32, i32) {
    %c0_i32 = arith.constant 0 : i32
    %c0_i32_0 = arith.constant 0 : i32
    %c0_i32_1 = arith.constant 0 : i32
    return %c0_i32, %c0_i32_0 : i32, i32
  }
  func.func @transform_6(%arg0: i32) -> (i32, i32) {
    %c0_i32 = arith.constant 0 : i32
    %c0_i32_0 = arith.constant 0 : i32
    %c0_i32_1 = arith.constant 0 : i32
    return %c0_i32, %c0_i32_0 : i32, i32
  }
  func.func @transform_7(%arg0: i32) -> (i32, i32) {
    %c0_i32 = arith.constant 0 : i32
    %c0_i32_0 = arith.constant 0 : i32
    %c0_i32_1 = arith.constant 0 : i32
    return %c0_i32, %c0_i32_0 : i32, i32
  }
  func.func @transform_8(%arg0: i32) -> (i32, i32, i32, i32) {
    %c0_i32 = arith.constant 0 : i32
    %c0_i32_0 = arith.constant 0 : i32
    %c0_i32_1 = arith.constant 0 : i32
    %c0_i32_2 = arith.constant 0 : i32
    return %arg0, %c0_i32, %c0_i32_0, %c0_i32_1 : i32, i32, i32, i32
  }
}

</mosaic_0001>

<bundles_post_ra>
// kernel: tpu_custom_call.1
= control target key start
LH: loop header
LB: loop body
LE: loop exit
PB: predicated region body
PF: predicated region fallthrough
CT: control target
= control target key end

     0   :  { %s2302_s27 = smov 0   ;;  %s3340_s0 = inlined_call_operand.vmem [shape: f32[2,16,16,4], index: 0, kind: input, shape index: {}]   ;;  %s3341_s1 = inlined_call_operand.vmem [shape: f32[2,16,16,4], index: 1, kind: input, shape index: {}]   ;;  %s3342_s2 = inlined_call_operand.vmem [shape: f32[8,4], index: 2, kind: input, shape index: {}]   ;;  %s3343_s3 = inlined_call_operand.vmem [shape: f32[1,4], index: 3, kind: input, shape index: {}]   ;;  %s3344_s4 = inlined_call_operand.vmem [shape: f32[9,4], index: 4, kind: input, shape index: {}]   ;;  %s3345_s5 = inlined_call_operand.vmem [shape: f32[1,4], index: 5, kind: input, shape index: {}]   ;;  %s3346_s6 = inlined_call_operand.vmem [shape: f32[4,4], index: 6, kind: input, shape index: {}]   ;;  %s3347_s7 = inlined_call_operand.vmem [shape: f32[1,4], index: 7, kind: input, shape index: {}]   ;;  %s3348_s8 = inlined_call_operand.vmem [shape: f32[2,16,16,4], index: 8, kind: output, shape index: {}]  }
   0x1 LB: > { %s2115_s28 = sadd.s32 4294967295, %s2253_s27   ;;  %p2119_p0 = scmp.ge.s32.totalorder %s2253_s27, 1  ;;  %s2253_s27 = sphi %s2302_s27, %s18_s27  }
   0x2   : > { %p272_p1 = scmp.lt.s32.totalorder %s2253_s27, 3 }
   0x4   : > { %p273_p2 = pnand %p2119_p0, %p272_p1 }
   0x5   : > { %p311_p3 = scmp.lt.s32.totalorder (!%p273_p2), %s2115_s28, 1  ;;  %s2255_s11 = smov (!%p273_p2), 4  }
   0x6   : > { %276 = sbr.rel (%p273_p2) target bundleno = 662 (0x296), region = 52 }
   0xb   : > { %s3350_s28 = smov (!%p311_p3, %s2115_s28), 1  ;;  %v551_v21 = vld [vmem:[%s3342_s2] sm:$0xff]  ;;  %vm518_vm0 = vcmask 31744   ;;  %vm556_vm1 = vcmask 64512   ;;  %vm768_vm2 = vcmask 25600   ;;  %vm1867_vm3 = vcmask 1043456  }
   0xc   : > { %s2310_s29 = sshll.u32 %s3350_s28, 8  ;;  %668 = vmatpush.msra.mxu0 %v551_v21  ;;  %2196 = vmatpush.msra.mxu2 %v551_v21 }
   0xd   : > { %s2316_s10 = scalar_lea.vmem %s3341_s1, %s2310_s29  ;;  %s2374_s16 = scalar_lea.vmem %s3340_s0, %s2310_s29 }
   0xe   : > { %v358_v0 = vld [vmem:[%s2316_s10] sm:$0xff]  ;;  %v360_v1 = vld [vmem:[%s2316_s10 + $0x10] sm:$0xff]  ;;  %v359_v3 = vld [vmem:[%s2316_s10 + $0x8] sm:$0xff]  ;;  %s3097_s18 = scalar_lea.vmem %s3348_s8, %s2310_s29 }
   0xf   : > { %422 = vrot.lane.b32.xlu0 %v358_v0, %s2255_s11  ;;  %426 = vrot.lane.b32.xlu1 %v360_v1, %s2255_s11  ;;  %v362_v2 = vld [vmem:[%s2316_s10 + $0x20] sm:$0xff]  ;;  %v361_v4 = vld [vmem:[%s2316_s10 + $0x18] sm:$0xff] }
  0x10   : > { %430 = vrot.lane.b32.xlu2 %v362_v2, %s2255_s11  ;;  %v363_v5 = vld [vmem:[%s2316_s10 + $0x28] sm:$0xff]  ;;  %v364_v6 = vld [vmem:[%s2316_s10 + $0x30] sm:$0xff]  ;;  %v365_v7 = vld [vmem:[%s2316_s10 + $0x38] sm:$0xff] }
  0x11   : > { %v366_v8 = vld [vmem:[%s2316_s10 + $0x40] sm:$0xff]  ;;  %v368_v9 = vld [vmem:[%s2316_s10 + $0x50] sm:$0xff]  ;;  %v367_v10 = vld [vmem:[%s2316_s10 + $0x48] sm:$0xff] }
  0x12   : > { %v369_v11 = vld [vmem:[%s2316_s10 + $0x58] sm:$0xff]  ;;  %v374_v12 = vld [vmem:[%s2316_s10 + $0x80] sm:$0xff]  ;;  %v371_v14 = vld [vmem:[%s2316_s10 + $0x68] sm:$0xff] }
  0x13   : > { %v370_v13 = vld [vmem:[%s2316_s10 + $0x60] sm:$0xff]  ;;  %v375_v15 = vld [vmem:[%s2316_s10 + $0x88] sm:$0xff]  ;;  %v372_v16 = vld [vmem:[%s2316_s10 + $0x70] sm:$0xff] }
  0x14   : > { %v376_v17 = vld [vmem:[%s2316_s10 + $0x90] sm:$0xff]  ;;  %v377_v18 = vld [vmem:[%s2316_s10 + $0x98] sm:$0xff]  ;;  %v379_v20 = vld [vmem:[%s2316_s10 + $0xa8] sm:$0xff] }
  0x15   : > { %v373_v19 = vld [vmem:[%s2316_s10 + $0x78] sm:$0xff]  ;;  %v380_v22 = vld [vmem:[%s2316_s10 + $0xb0] sm:$0xff]  ;;  %v378_v23 = vld [vmem:[%s2316_s10 + $0xa0] sm:$0xff] }
  0x16   : > { %v382_v24 = vld [vmem:[%s2316_s10 + $0xc0] sm:$0xff]  ;;  %v383_v25 = vld [vmem:[%s2316_s10 + $0xc8] sm:$0xff]  ;;  %v381_v29 = vld [vmem:[%s2316_s10 + $0xb8] sm:$0xff] }
  0x17   : > { %424 = vrot.lane.b32.xlu0 %v359_v3, %s2255_s11  ;;  %428 = vrot.lane.b32.xlu1 %v361_v4, %s2255_s11  ;;  %v326_v26 = vld [vmem:[%s2374_s16] sm:$0xff]  ;;  %v327_v31 = vld [vmem:[%s2374_s16 + $0x8] sm:$0xff] }
  0x18   : > { %432 = vrot.lane.b32.xlu2 %v363_v5, %s2255_s11  ;;  %v385_v35 = vld [vmem:[%s2316_s10 + $0xd8] sm:$0xff]  ;;  %v328_v36 = vld [vmem:[%s2374_s16 + $0x10] sm:$0xff]  ;;  %v386_v39 = vld [vmem:[%s2316_s10 + $0xe0] sm:$0xff] }
  0x19   : > { %v329_v40 = vld [vmem:[%s2374_s16 + $0x18] sm:$0xff]  ;;  %v384_v45 = vld [vmem:[%s2316_s10 + $0xd0] sm:$0xff]  ;;  %v330_v46 = vld [vmem:[%s2374_s16 + $0x20] sm:$0xff] }
  0x1a   : > { %v388_v51 = vld [vmem:[%s2316_s10 + $0xf0] sm:$0xff]  ;;  %v331_v52 = vld [vmem:[%s2374_s16 + $0x28] sm:$0xff]  ;;  %v342_v57 = vld [vmem:[%s2374_s16 + $0x80] sm:$0xff] }
  0x1b   : > { %v389_v58 = vld [vmem:[%s2316_s10 + $0xf8] sm:$0xff]  ;;  %v332_v60 = vld [vmem:[%s2374_s16 + $0x30] sm:$0xff]  ;;  %v343_v0 = vld [vmem:[%s2374_s16 + $0x88] sm:$0xff] }
  0x1c   : > { %v387_v1 = vld [vmem:[%s2316_s10 + $0xe8] sm:$0xff]  ;;  %v333_v3 = vld [vmem:[%s2374_s16 + $0x38] sm:$0xff] }
  0x1f   : > { %434 = vrot.lane.b32.xlu0 %v364_v6, %s2255_s11  ;;  %436 = vrot.lane.b32.xlu1 %v365_v7, %s2255_s11  ;;  %v344_v7 = vld [vmem:[%s2374_s16 + $0x90] sm:$0xff] }
  0x20   : > { %438 = vrot.lane.b32.xlu2 %v366_v8, %s2255_s11 }
  0x27   : > { %442 = vrot.lane.b32.xlu1 %v368_v9, %s2255_s11  ;;  %440 = vrot.lane.b32.xlu0 %v367_v10, %s2255_s11  ;;  %v334_v9 = vld [vmem:[%s2374_s16 + $0x40] sm:$0xff] }
  0x28   : > { %444 = vrot.lane.b32.xlu2 %v369_v11, %s2255_s11 }
  0x2f   : > { %454 = vrot.lane.b32.xlu1 %v374_v12, %s2255_s11  ;;  %446 = vrot.lane.b32.xlu0 %v370_v13, %s2255_s11  ;;  %v345_v12 = vld [vmem:[%s2374_s16 + $0x98] sm:$0xff] }
  0x30   : > { %448 = vrot.lane.b32.xlu2 %v371_v14, %s2255_s11  ;;  %v335_v14 = vld [vmem:[%s2374_s16 + $0x48] sm:$0xff] }
  0x37   : > { %456 = vrot.lane.b32.xlu0 %v375_v15, %s2255_s11  ;;  %450 = vrot.lane.b32.xlu1 %v372_v16, %s2255_s11 }
  0x38   : > { %458 = vrot.lane.b32.xlu2 %v376_v17, %s2255_s11 }
  0x3f   : > { %460 = vrot.lane.b32.xlu1 %v377_v18, %s2255_s11  ;;  %452 = vrot.lane.b32.xlu0 %v373_v19, %s2255_s11  ;;  %v346_v18 = vld [vmem:[%s2374_s16 + $0xa0] sm:$0xff] }
  0x40   : > { %462 = vrot.lane.b32.xlu2 %v378_v23, %s2255_s11  ;;  %v347_v23 = vld [vmem:[%s2374_s16 + $0xa8] sm:$0xff] }
  0x47   : > { %464 = vrot.lane.b32.xlu0 %v379_v20, %s2255_s11  ;;  %466 = vrot.lane.b32.xlu1 %v380_v22, %s2255_s11  ;;  %v336_v20 = vld [vmem:[%s2374_s16 + $0x50] sm:$0xff] }
  0x48   : > { %468 = vrot.lane.b32.xlu2 %v381_v29, %s2255_s11 }
  0x4f   : > { %470 = vrot.lane.b32.xlu0 %v382_v24, %s2255_s11  ;;  %472 = vrot.lane.b32.xlu1 %v383_v25, %s2255_s11  ;;  %v337_v25 = vld [vmem:[%s2374_s16 + $0x58] sm:$0xff] }
  0x50   : > { %474 = vrot.lane.b32.xlu2 %v384_v45, %s2255_s11  ;;  %v351_v45 = vld [vmem:[%s2374_s16 + $0xc8] sm:$0xff] }
  0x57   : > { %476 = vrot.lane.b32.xlu0 %v385_v35, %s2255_s11  ;;  %478 = vrot.lane.b32.xlu1 %v386_v39, %s2255_s11  ;;  %v350_v39 = vld [vmem:[%s2374_s16 + $0xc0] sm:$0xff] }
  0x58   : > { %480 = vrot.lane.b32.xlu2 %v387_v1, %s2255_s11 }
  0x5f   : > { %482 = vrot.lane.b32.xlu0 %v388_v51, %s2255_s11  ;;  %484 = vrot.lane.b32.xlu1 %v389_v58, %s2255_s11  ;;  %v2547_v51 = vld [vmem:[%s3343_s3] ss:$0 sm:$0xff] }
  0x6a   : > { %v431_v34 = vpop.permute.xlu2 %430 }
  0x6b   : > { %v523_v50 = vsel %vm518_vm0, %v330_v46, %v431_v34  ;;  %v349_v34 = vld [vmem:[%s2374_s16 + $0xb8] sm:$0xff] }
  0x72   : > { %v433_v41 = vpop.permute.xlu2 %432 }
  0x73   : > { %v524_v55 = vsel %vm518_vm0, %v331_v52, %v433_v41  ;;  %v340_v41 = vld [vmem:[%s2374_s16 + $0x70] sm:$0xff] }
  0x7a   : > { %v439_v47 = vpop.permute.xlu2 %438 }
  0x7b   : > { %v527_v10 = vsel %vm518_vm0, %v334_v9, %v439_v47  ;;  %v354_v9 = vld [vmem:[%s2374_s16 + $0xe0] sm:$0xff] }
  0x81   : > { %v423_v27 = vpop.permute.xlu0 %422  ;;  %v427_v30 = vpop.permute.xlu1 %426 }
  0x82   : > { %v519_v28 = vsel %vm518_vm0, %v326_v26, %v423_v27  ;;  %v521_v38 = vsel %vm518_vm0, %v328_v36, %v427_v30  ;;  %v445_v53 = vpop.permute.xlu2 %444  ;;  %v338_v30 = vld [vmem:[%s2374_s16 + $0x60] sm:$0xff]  ;;  %v339_v36 = vld [vmem:[%s2374_s16 + $0x68] sm:$0xff] }
  0x83   : > { %2126 = vmatmul.msk.f32.vlgmr.msra.gmra.mxu0 %vm556_vm1, %v519_v28  ;;  %v530_v26 = vsel %vm518_vm0, %v337_v25, %v445_v53  ;;  %v348_v28 = vld [vmem:[%s2374_s16 + $0xb0] sm:$0xff]  ;;  %v2561_v53 = vld [vmem:[%s3344_s4] sm:$0xff] }
  0x89   : > { %v425_v32 = vpop.permute.xlu0 %424  ;;  %v429_v37 = vpop.permute.xlu1 %428 }
  0x8a   : > { %v520_v33 = vsel %vm518_vm0, %v327_v31, %v425_v32  ;;  %v522_v44 = vsel %vm518_vm0, %v329_v40, %v429_v37  ;;  %v2411_v61 = vpop.permute.xlu2 %448  ;;  %v2256_v31 = vmov 0.0  }
  0x8b   : > { %2127 = vmatmul.msk.f32.gmra.mxu0 %vm556_vm1, %v520_v33  ;;  %770 = vst.msk [vmem:[#allocation2 + $0x18] sm:$0xff] %vm518_vm0, %v2256_v31  ;;  %v532_v37 = vsel %vm518_vm0, %v339_v36, %v2411_v61 }
  0x8c   : > { %771 = vst.msk [vmem:[#allocation2 + $0x20] sm:$0xff] %vm518_vm0, %v2256_v31 }
  0x8d   : > { %766 = vst.msk [vmem:[#allocation2] sm:$0xff] %vm518_vm0, %v2256_v31 }
  0x8e   : > { %767 = vst.msk [vmem:[#allocation2 + $0x8] sm:$0xff] %vm518_vm0, %v2256_v31 }
  0x8f   : > { %773 = vst.msk [vmem:[#allocation2 + $0x30] sm:$0xff] %vm518_vm0, %v2256_v31 }
  0x90   : > { %774 = vst.msk [vmem:[#allocation2 + $0x38] sm:$0xff] %vm518_vm0, %v2256_v31 }
  0x91   : > { %v435_v42 = vpop.permute.xlu0 %434  ;;  %v437_v43 = vpop.permute.xlu1 %436  ;;  %776 = vst.msk [vmem:[#allocation2 + $0x48] sm:$0xff] %vm518_vm0, %v2256_v31 }
  0x92   : > { %v525_v62 = vsel %vm518_vm0, %v332_v60, %v435_v42  ;;  %v526_v5 = vsel %vm518_vm0, %v333_v3, %v437_v43  ;;  %v459_v6 = vpop.permute.xlu2 %458  ;;  %777 = vst.msk [vmem:[#allocation2 + $0x50] sm:$0xff] %vm518_vm0, %v2256_v31  ;;  %v341_v43 = vld [vmem:[%s2374_s16 + $0x78] sm:$0xff]  ;;  %v2586_v60 = vld [vmem:[%s3345_s5] ss:$0 sm:$0xff] }
  0x93   : > { %2128 = vmatmul.msk.f32.gmra.mxu0 %vm556_vm1, %v521_v38  ;;  %v537_v8 = vsel %vm518_vm0, %v344_v7, %v459_v6  ;;  %779 = vst.msk [vmem:[#allocation2 + $0x60] sm:$0xff] %vm518_vm0, %v2256_v31  ;;  %v1766_v3 = vld [vmem:[%s3346_s6] sm:$0xf]  ;;  %v2607_v7 = vperm.slane %v2561_v53, 2 }
  0x94   : > { %780 = vst.msk [vmem:[#allocation2 + $0x68] sm:$0xff] %vm518_vm0, %v2256_v31  ;;  %2158 = vmatpush.msk.msra.mxu1 %vm1867_vm3, %v1766_v3  ;;  %2197 = vmatpush.msk.msra.mxu3 %vm1867_vm3, %v1766_v3 }
  0x95   : > { %782 = vst.msk [vmem:[#allocation2 + $0x78] sm:$0xff] %vm518_vm0, %v2256_v31  ;;  %v957_v1 = vld [vmem:[#allocation2 + $0x1] sm:$0xff] }
  0x96   : > { %783 = vst.msk [vmem:[#allocation2 + $0x80] sm:$0xff] %vm518_vm0, %v2256_v31 }
  0x97   : > { %785 = vst.msk [vmem:[#allocation2 + $0x90] sm:$0xff] %vm518_vm0, %v2256_v31 }
  0x98   : > { %786 = vst.msk [vmem:[#allocation2 + $0x98] sm:$0xff] %vm518_vm0, %v2256_v31 }
  0x99   : > { %v441_v48 = vpop.permute.xlu0 %440  ;;  %v443_v49 = vpop.permute.xlu1 %442  ;;  %788 = vst.msk [vmem:[#allocation2 + $0xa8] sm:$0xff] %vm518_vm0, %v2256_v31 }
  0x9a   : > { %v528_v16 = vsel %vm518_vm0, %v335_v14, %v441_v48  ;;  %v463_v17 = vpop.permute.xlu2 %462  ;;  %v529_v21 = vsel %vm518_vm0, %v336_v20, %v443_v49  ;;  %789 = vst.msk [vmem:[#allocation2 + $0xb0] sm:$0xff] %vm518_vm0, %v2256_v31  ;;  %v352_v49 = vld [vmem:[%s2374_s16 + $0xd0] sm:$0xff] }
  0x9b   : > { %2129 = vmatmul.msk.f32.gmra.mxu0 %vm556_vm1, %v522_v44  ;;  %v539_v19 = vsel %vm518_vm0, %v346_v18, %v463_v17  ;;  %791 = vst.msk [vmem:[#allocation2 + $0xc0] sm:$0xff] %vm518_vm0, %v2256_v31  ;;  %v2623_v17 = vperm.slane %v2561_v53, 3 }
  0x9c   : > { %792 = vst.msk [vmem:[#allocation2 + $0xc8] sm:$0xff] %vm518_vm0, %v2256_v31 }
  0x9d   : > { %794 = vst.msk [vmem:[#allocation2 + $0xd8] sm:$0xff] %vm518_vm0, %v2256_v31 }
  0x9e   : > { %795 = vst.msk [vmem:[#allocation2 + $0xe0] sm:$0xff] %vm518_vm0, %v2256_v31 }
  0x9f   : > { %797 = vst.msk [vmem:[#allocation2 + $0xf0] sm:$0xff] %vm518_vm0, %v2256_v31 }
  0xa0   : > { %798 = vst.msk [vmem:[#allocation2 + $0xf8] sm:$0xff] %vm518_vm0, %v2256_v31 }
  0xa1   : > { %v447_v54 = vpop.permute.xlu0 %446  ;;  %v455_v56 = vpop.permute.xlu1 %454  ;;  %800 = vst.msk [vmem:[#allocation2 + $0x108] sm:$0xff] %vm518_vm0, %v2256_v31 }
  0xa2   : > { %v535_v59 = vsel %vm518_vm0, %v342_v57, %v455_v56  ;;  %v531_v32 = vsel %vm518_vm0, %v338_v30, %v447_v54  ;;  %v469_v33 = vpop.permute.xlu2 %468  ;;  %801 = vst.msk [vmem:[#allocation2 + $0x110] sm:$0xff] %vm518_vm0, %v2256_v31  ;;  %v353_v56 = vld [vmem:[%s2374_s16 + $0xd8] sm:$0xff]  ;;  %v2571_v57 = vperm.slane %v2561_v53, 0  ;;  %v2643_v30 = vperm.slane %v2561_v53, 4 }
  0xa3   : > { %2130 = vmatmul.msk.f32.gmra.mxu0 %vm556_vm1, %v523_v50  ;;  %2142 = vmatmul.msk.f32.vlgmr.msra.gmra.mxu2 %vm556_vm1, %v535_v59  ;;  %v542_v35 = vsel %vm518_vm0, %v349_v34, %v469_v33  ;;  %803 = vst.msk [vmem:[#allocation2 + $0x120] sm:$0xff] %vm518_vm0, %v2256_v31  ;;  %v860_v59 = vld [vmem:[#allocation2] sm:$0xff] }
  0xa4   : > { %804 = vst.msk [vmem:[#allocation2 + $0x128] sm:$0xff] %vm518_vm0, %v2256_v31  ;;  %v893_v61 = vmul.f32 %v2571_v57, %v860_v59 }
  0xa5   : > { %806 = vst.msk [vmem:[#allocation2 + $0x138] sm:$0xff] %vm518_vm0, %v2256_v31 }
  0xa6   : > { %807 = vst.msk [vmem:[#allocation2 + $0x140] sm:$0xff] %vm518_vm0, %v2256_v31 }
  0xa7   : > { %809 = vst.msk [vmem:[#allocation2 + $0x150] sm:$0xff] %vm518_vm0, %v2256_v31 }
  0xa8   : > { %810 = vst.msk [vmem:[#allocation2 + $0x158] sm:$0xff] %vm518_vm0, %v2256_v31 }
  0xa9   : > { %v457_v63 = vpop.permute.xlu0 %456  ;;  %v2421_v4 = vpop.permute.xlu1 %450  ;;  %812 = vst.msk [vmem:[#allocation2 + $0x168] sm:$0xff] %vm518_vm0, %v2256_v31 }
  0xaa   : > { %v536_v2 = vsel %vm518_vm0, %v343_v0, %v457_v63  ;;  %v533_v42 = vsel %vm518_vm0, %v340_v41, %v2421_v4  ;;  %v475_v48 = vpop.permute.xlu2 %474  ;;  %813 = vst.msk [vmem:[#allocation2 + $0x170] sm:$0xff] %vm518_vm0, %v2256_v31  ;;  %v861_v63 = vld [vmem:[#allocation2 + $0x8] sm:$0xff]  ;;  %v2654_v41 = vperm.slane %v2561_v53, 6 }
  0xab   : > { %2131 = vmatmul.msk.f32.gmra.mxu0 %vm556_vm1, %v524_v55  ;;  %2143 = vmatmul.msk.f32.gmra.mxu2 %vm556_vm1, %v536_v2  ;;  %v545_v50 = vsel %vm518_vm0, %v352_v49, %v475_v48  ;;  %815 = vst.msk [vmem:[#allocation2 + $0x180] sm:$0xff] %vm518_vm0, %v2256_v31  ;;  %v894_v4 = vmul.f32 %v2571_v57, %v861_v63 }
  0xac   : > { %816 = vst.msk [vmem:[#allocation2 + $0x188] sm:$0xff] %vm518_vm0, %v2256_v31 }
  0xad   : > { %818 = vst.msk [vmem:[#allocation2 + $0x198] sm:$0xff] %vm518_vm0, %v2256_v31 }
  0xae   : > { %819 = vst.msk [vmem:[#allocation2 + $0x1a0] sm:$0xff] %vm518_vm0, %v2256_v31 }
  0xaf   : > { %772 = vst.msk [vmem:[#allocation2 + $0x28] sm:$0x3] %vm768_vm2, %v2256_v31 }
  0xb0   : > { %769 = vst.msk [vmem:[#allocation2 + $0x10] sm:$0x3] %vm768_vm2, %v2256_v31 }
  0xb1   : > { %v461_v11 = vpop.permute.xlu1 %460  ;;  %v2435_v15 = vpop.permute.xlu0 %452  ;;  %775 = vst.msk [vmem:[#allocation2 + $0x40] sm:$0x3] %vm768_vm2, %v2256_v31 }
  0xb2   : > { %v538_v13 = vsel %vm518_vm0, %v345_v12, %v461_v11  ;;  %v534_v47 = vsel %vm518_vm0, %v341_v43, %v2435_v15  ;;  %778 = vst.msk [vmem:[#allocation2 + $0x58] sm:$0x3] %vm768_vm2, %v2256_v31  ;;  %v1054_v11 = vld [vmem:[#allocation2 + $0x2] sm:$0xff] }
  0xb3   : > { %2132 = vmatmul.msk.f32.gmra.mxu0 %vm556_vm1, %v525_v62  ;;  %2144 = vmatmul.msk.f32.gmra.mxu2 %vm556_vm1, %v537_v8  ;;  %781 = vst.msk [vmem:[#allocation2 + $0x70] sm:$0x3] %vm768_vm2, %v2256_v31  ;;  %v2590_v62 = vperm.slane %v2561_v53, 1 }
  0xb4   : > { %784 = vst.msk [vmem:[#allocation2 + $0x88] sm:$0x3] %vm768_vm2, %v2256_v31 }
  0xb5   : > { %787 = vst.msk [vmem:[#allocation2 + $0xa0] sm:$0x3] %vm768_vm2, %v2256_v31  ;;  %v990_v6 = vmul.f32 %v2590_v62, %v957_v1  ;;  %v2672_v1 = vld [vmem:[%s3344_s4 + $0x8] ss:$0 sm:$0xff] }
  0xb6   : > { %790 = vst.msk [vmem:[#allocation2 + $0xb8] sm:$0x3] %vm768_vm2, %v2256_v31 }
  0xb7   : > { %793 = vst.msk [vmem:[#allocation2 + $0xd0] sm:$0x3] %vm768_vm2, %v2256_v31  ;;  %v1055_v18 = vld [vmem:[#allocation2 + $0xa] sm:$0xff] }
  0xb8   : > { %796 = vst.msk [vmem:[#allocation2 + $0xe8] sm:$0x3] %vm768_vm2, %v2256_v31 }
  0xb9   : > { %v465_v22 = vpop.permute.xlu0 %464  ;;  %v467_v27 = vpop.permute.xlu1 %466  ;;  %799 = vst.msk [vmem:[#allocation2 + $0x100] sm:$0x3] %vm768_vm2, %v2256_v31 }
  0xba   : > { %v540_v24 = vsel %vm518_vm0, %v347_v23, %v465_v22  ;;  %v541_v29 = vsel %vm518_vm0, %v348_v28, %v467_v27  ;;  %802 = vst.msk [vmem:[#allocation2 + $0x118] sm:$0x3] %vm768_vm2, %v2256_v31  ;;  %v1088_v23 = vmul.f32 %v2607_v7, %v1055_v18  ;;  %v481_v27 = vpop.permute.xlu2 %480  ;;  %v355_v28 = vld [vmem:[%s2374_s16 + $0xe8] sm:$0xff] }
  0xbb   : > { %2133 = vmatmul.msk.f32.gmra.mxu0 %vm556_vm1, %v526_v5  ;;  %2145 = vmatmul.msk.f32.gmra.mxu2 %vm556_vm1, %v538_v13  ;;  %v925_v5 = vadd.f32 %v2586_v60, %v893_v61  ;;  %v926_v13 = vadd.f32 %v2586_v60, %v894_v4  ;;  %805 = vst.msk [vmem:[#allocation2 + $0x130] sm:$0x3] %vm768_vm2, %v2256_v31 }
  0xbc   : > { %808 = vst.msk [vmem:[#allocation2 + $0x148] sm:$0x3] %vm768_vm2, %v2256_v31 }
  0xbd   : > { %v1022_v15 = vadd.f32 %v990_v6, %v925_v5  ;;  %811 = vst.msk [vmem:[#allocation2 + $0x160] sm:$0x3] %vm768_vm2, %v2256_v31 }
  0xbe   : > { %814 = vst.msk [vmem:[#allocation2 + $0x178] sm:$0x3] %vm768_vm2, %v2256_v31 }
  0xbf   : > { %817 = vst.msk [vmem:[#allocation2 + $0x190] sm:$0x3] %vm768_vm2, %v2256_v31 }
  0xc0   : > { %820 = vst.msk [vmem:[#allocation2 + $0x1a8] sm:$0x3] %vm768_vm2, %v2256_v31 }
  0xc1   : > { %v471_v38 = vpop.permute.xlu0 %470  ;;  %v473_v44 = vpop.permute.xlu1 %472 }
  0xc2   : > { %v543_v40 = vsel %vm518_vm0, %v350_v39, %v471_v38  ;;  %v544_v46 = vsel %vm518_vm0, %v351_v45, %v473_v44 }
  0xc3   : > { %2134 = vmatmul.msk.f32.gmra.mxu0 %vm556_vm1, %v527_v10  ;;  %2146 = vmatmul.msk.f32.gmra.mxu2 %vm556_vm1, %v539_v19  ;;  %v958_v10 = vld [vmem:[#allocation2 + $0x9] sm:$0xff] }
  0xc4   : > { %v991_v14 = vmul.f32 %v2590_v62, %v958_v10 }
  0xc6   : > { %v1023_v22 = vadd.f32 %v991_v14, %v926_v13 }
  0xc9   : > { %v477_v55 = vpop.permute.xlu0 %476  ;;  %v479_v8 = vpop.permute.xlu1 %478 }
  0xca   : > { %v546_v58 = vsel %vm518_vm0, %v353_v56, %v477_v55  ;;  %v547_v12 = vsel %vm518_vm0, %v354_v9, %v479_v8  ;;  %v2664_v56 = vperm.slane %v2561_v53, 7 }
  0xcb   : > { %2135 = vmatmul.msk.f32.gmra.mxu0 %vm556_vm1, %v528_v16  ;;  %2147 = vmatmul.msk.f32.gmra.mxu2 %vm556_vm1, %v540_v24  ;;  %v1087_v16 = vmul.f32 %v2607_v7, %v1054_v11 }
  0xcd   : > { %v1119_v24 = vadd.f32 %v1087_v16, %v1022_v15 }
  0xd3   : > { %2136 = vmatmul.msk.f32.gmra.mxu0 %vm556_vm1, %v529_v21  ;;  %2148 = vmatmul.msk.f32.gmra.mxu2 %vm556_vm1, %v541_v29  ;;  %v548_v29 = vsel %vm518_vm0, %v355_v28, %v481_v27 }
  0xdb   : > { %2137 = vmatmul.msk.f32.gmra.mxu0 %vm556_vm1, %v530_v26  ;;  %2149 = vmatmul.msk.f32.gmra.mxu2 %vm556_vm1, %v542_v35  ;;  %v1120_v35 = vadd.f32 %v1088_v23, %v1023_v22 }
  0xe3   : > { %2138 = vmatmul.msk.f32.gmra.mxu0 %vm556_vm1, %v531_v32  ;;  %2150 = vmatmul.msk.f32.gmra.mxu2 %vm556_vm1, %v543_v40  ;;  %v2646_v32 = vperm.slane %v2561_v53, 5 }
  0xeb   : > { %2139 = vmatmul.msk.f32.gmra.mxu0 %vm556_vm1, %v532_v37  ;;  %2151 = vmatmul.msk.f32.gmra.mxu2 %vm556_vm1, %v544_v46  ;;  %v483_v46 = vpop.permute.xlu0 %482 }
  0xf3   : > { %2140 = vmatmul.msk.f32.gmra.mxu0 %vm556_vm1, %v533_v42  ;;  %2152 = vmatmul.msk.f32.gmra.mxu2 %vm556_vm1, %v545_v50 }
  0xfb   : > { %2141 = vmatmul.msk.f32.gmra.mxu0 %vm556_vm1, %v534_v47  ;;  %2153 = vmatmul.msk.f32.gmra.mxu2 %vm556_vm1, %v546_v58  ;;  %v356_v47 = vld [vmem:[%s2374_s16 + $0xf0] sm:$0xff] }
  0xfc   : > { %v549_v50 = vsel %vm518_vm0, %v356_v47, %v483_v46 }
 0x100   : > { %v670_v52 = vpop.f32.mrf.mxu0 }
 0x101   : > { %v671_v54 = vadd.f32 %v2547_v51, %v670_v52 }
 0x103   : > { %822 = vst.msk [vmem:[#allocation2 + $0x19] sm:$0xff] %vm518_vm0, %v671_v54  ;;  %2154 = vmatmul.msk.f32.gmra.mxu2 %vm556_vm1, %v547_v12 }
 0x108   : > { %v673_v0 = vpop.f32.mrf.mxu0 }
 0x109   : > { %v674_v2 = vadd.f32 %v2547_v51, %v673_v0 }
 0x10a   : > { %v1151_v20 = vld [vmem:[#allocation2 + $0x18] sm:$0xff] }
 0x10b   : > { %823 = vst.msk [vmem:[#allocation2 + $0x21] sm:$0xff] %vm518_vm0, %v674_v2  ;;  %v1184_v25 = vmul.f32 %v2623_v17, %v1151_v20  ;;  %v1248_v33 = vld [vmem:[#allocation2 + $0x19] sm:$0xff]  ;;  %2155 = vmatmul.msk.f32.gmra.mxu2 %vm556_vm1, %v548_v29  ;;  %v895_v44 = vmul.f32 %v1151_v20, %v2571_v57  ;;  %v485_v20 = vpop.permute.xlu1 %484 }
 0x10c   : > { %v1281_v39 = vmul.f32 %v2643_v30, %v1248_v33  ;;  %v992_v53 = vmul.f32 %v1248_v33, %v2590_v62 }
 0x10d   : > { %v1216_v37 = vadd.f32 %v1184_v25, %v1119_v24  ;;  %v927_v63 = vadd.f32 %v2586_v60, %v895_v44 }
 0x10f   : > { %v1313_v45 = vadd.f32 %v1281_v39, %v1216_v37  ;;  %v1024_v13 = vadd.f32 %v992_v53, %v927_v63 }
 0x110   : > { %v676_v19 = vpop.f32.mrf.mxu0 }
 0x111   : > { %v677_v21 = vadd.f32 %v2547_v51, %v676_v19 }
 0x112   : > { %v1152_v26 = vld [vmem:[#allocation2 + $0x20] sm:$0xff] }
 0x113   : > { %824 = vst.msk [vmem:[#allocation2 + $0x31] sm:$0xff] %vm518_vm0, %v677_v21  ;;  %v1345_v34 = vld [vmem:[#allocation2 + $0x1a] sm:$0xff]  ;;  %v1185_v36 = vmul.f32 %v2623_v17, %v1152_v26  ;;  %v896_v52 = vmul.f32 %v1152_v26, %v2571_v57  ;;  %v1346_v58 = vld [vmem:[#allocation2 + $0x22] sm:$0xff]  ;;  %2156 = vmatmul.msk.f32.gmra.mxu2 %vm556_vm1, %v549_v50 }
 0x114   : > { %v1378_v40 = vmul.f32 %v2646_v32, %v1345_v34  ;;  %v1249_v42 = vld [vmem:[#allocation2 + $0x21] sm:$0xff]  ;;  %v1379_v3 = vmul.f32 %v2646_v32, %v1346_v58  ;;  %v1089_v4 = vmul.f32 %v1345_v34, %v2607_v7  ;;  %v357_v21 = vld [vmem:[%s2374_s16 + $0xf8] sm:$0xff]  ;;  %v1090_v29 = vmul.f32 %v1346_v58, %v2607_v7 }
 0x115   : > { %v1217_v43 = vadd.f32 %v1185_v36, %v1120_v35  ;;  %v1282_v49 = vmul.f32 %v2643_v30, %v1249_v42  ;;  %v928_v5 = vadd.f32 %v2586_v60, %v896_v52  ;;  %v993_v14 = vmul.f32 %v1249_v42, %v2590_v62 }
 0x116   : > { %v1410_v54 = vadd.f32 %v1378_v40, %v1313_v45  ;;  %v1121_v22 = vadd.f32 %v1089_v4, %v1024_v13  ;;  %v550_v27 = vsel %vm518_vm0, %v357_v21, %v485_v20 }
 0x117   : > { %v1314_v61 = vadd.f32 %v1282_v49, %v1217_v43  ;;  %v1025_v23 = vadd.f32 %v993_v14, %v928_v5 }
 0x118   : > { %v679_v31 = vpop.f32.mrf.mxu0 }
 0x119   : > { %v680_v38 = vadd.f32 %v2547_v51, %v679_v31  ;;  %v1411_v10 = vadd.f32 %v1379_v3, %v1314_v61  ;;  %v1122_v31 = vadd.f32 %v1090_v29, %v1025_v23 }
 0x11a   : > { %v1443_v48 = vld [vmem:[#allocation2 + $0x30] sm:$0xff] }
 0x11b   : > { %825 = vst.msk [vmem:[#allocation2 + $0x39] sm:$0xff] %vm518_vm0, %v680_v38  ;;  %v1476_v55 = vmul.f32 %v2654_v41, %v1443_v48  ;;  %v2666_v59 = vld [vmem:[#allocation2 + $0x31] sm:$0xff]  ;;  %v1186_v19 = vmul.f32 %v1443_v48, %v2623_v17  ;;  %2157 = vmatmul.msk.f32.gmra.mxu2 %vm556_vm1, %v550_v27  ;;  %v897_v45 = vmul.f32 %v1443_v48, %v2571_v57 }
 0x11c   : > { %v1573_v8 = vmul.f32 %v2664_v56, %v2666_v59  ;;  %v1283_v40 = vmul.f32 %v2666_v59, %v2643_v30  ;;  %v994_v3 = vmul.f32 %v2666_v59, %v2590_v62 }
 0x11d   : > { %v1508_v0 = vadd.f32 %v1476_v55, %v1410_v54  ;;  %v1218_v36 = vadd.f32 %v1186_v19, %v1121_v22  ;;  %v929_v61 = vadd.f32 %v2586_v60, %v897_v45 }
 0x11f   : > { %v1605_v15 = vadd.f32 %v1573_v8, %v1508_v0  ;;  %v1315_v47 = vadd.f32 %v1283_v40, %v1218_v36  ;;  %v1026_v14 = vadd.f32 %v994_v3, %v929_v61 }
 0x120   : > { %v682_v2 = vpop.f32.mrf.mxu0 }
 0x121   : > { %v683_v6 = vadd.f32 %v2547_v51, %v682_v2 }
 0x122   : > { %v1637_v9 = vld [vmem:[#allocation2 + $0x32] sm:$0xff]  ;;  %v1638_v28 = vld [vmem:[#allocation2 + $0x3a] sm:$0xff] }
 0x123   : > { %v1444_v11 = vld [vmem:[#allocation2 + $0x38] sm:$0xff]  ;;  %826 = vst.msk [vmem:[#allocation2 + $0x49] sm:$0xff] %vm518_vm0, %v683_v6  ;;  %v1670_v16 = vmul.f32 %v2672_v1, %v1637_v9  ;;  %v1671_v39 = vmul.f32 %v2672_v1, %v1638_v28  ;;  %v1380_v42 = vmul.f32 %v1637_v9, %v2646_v32  ;;  %v1381_v48 = vmul.f32 %v1638_v28, %v2646_v32 }
 0x124   : > { %v1541_v12 = vld [vmem:[#allocation2 + $0x39] sm:$0xff]  ;;  %v1477_v18 = vmul.f32 %v2654_v41, %v1444_v11  ;;  %v1187_v33 = vmul.f32 %v1444_v11, %v2623_v17  ;;  %v898_v52 = vmul.f32 %v1444_v11, %v2571_v57  ;;  %v1091_v6 = vmul.f32 %v1637_v9, %v2607_v7 }
 0x125   : > { %v1702_v24 = vadd.f32 %v1670_v16, %v1605_v15  ;;  %v1574_v26 = vmul.f32 %v2664_v56, %v1541_v12  ;;  %v1284_v50 = vmul.f32 %v1541_v12, %v2643_v30  ;;  %v1412_v54 = vadd.f32 %v1380_v42, %v1315_v47 }
 0x126   : > { %v1509_v25 = vadd.f32 %v1477_v18, %v1411_v10  ;;  %v1219_v44 = vadd.f32 %v1187_v33, %v1122_v31  ;;  %v930_v53 = vadd.f32 %v2586_v60, %v898_v52  ;;  %v995_v15 = vmul.f32 %v1541_v12, %v2590_v62  ;;  %v718_v20 = vpop.f32.mrf.mxu2 }
 0x127   : > { %v1734_v34 = vmax.f32 %v1702_v24, 0.0  ;;  %v719_v21 = vadd.f32 %v2547_v51, %v718_v20  ;;  %v1092_v12 = vmul.f32 %v1638_v28, %v2607_v7 }
 0x128   : > { %v1606_v35 = vadd.f32 %v1574_v26, %v1509_v25  ;;  %v685_v37 = vpop.f32.mrf.mxu0  ;;  %v1316_v58 = vadd.f32 %v1284_v50, %v1219_v44  ;;  %v1027_v9 = vadd.f32 %v995_v15, %v930_v53  ;;  %v1123_v25 = vadd.f32 %v1091_v6, %v1026_v14 }
 0x129   : > { %v686_v38 = vadd.f32 %v2547_v51, %v685_v37  ;;  %2159 = vmatmul.msk.f32.vlgmr.msra.gmra.mxu1 %vm518_vm0, %v1734_v34  ;;  %838 = vst.msk [vmem:[#allocation2 + $0xd9] sm:$0xff] %vm518_vm0, %v719_v21 }
 0x12a   : > { %v1445_v43 = vld [vmem:[#allocation2 + $0x48] sm:$0xff]  ;;  %v1703_v46 = vadd.f32 %v1671_v39, %v1606_v35  ;;  %v1413_v10 = vadd.f32 %v1381_v48, %v1316_v58  ;;  %v1124_v36 = vadd.f32 %v1092_v12, %v1027_v9 }
 0x12b   : > { %827 = vst.msk [vmem:[#allocation2 + $0x51] sm:$0xff] %vm518_vm0, %v686_v38  ;;  %v1478_v49 = vmul.f32 %v2654_v41, %v1445_v43  ;;  %v2704_v55 = vld [vmem:[#allocation2 + $0x49] sm:$0xff]  ;;  %v1188_v19 = vmul.f32 %v1445_v43, %v2623_v17  ;;  %v899_v42 = vmul.f32 %v1445_v43, %v2571_v57 }
 0x12c   : > { %v1735_v63 = vmax.f32 %v1703_v46, 0.0  ;;  %v1575_v5 = vmul.f32 %v2664_v56, %v2704_v55  ;;  %v1285_v38 = vmul.f32 %v2704_v55, %v2643_v30  ;;  %v996_v3 = vmul.f32 %v2704_v55, %v2590_v62 }
 0x12d   : > { %v1510_v0 = vadd.f32 %v1478_v49, %v1412_v54  ;;  %v1220_v34 = vadd.f32 %v1188_v19, %v1123_v25  ;;  %v931_v43 = vadd.f32 %v2586_v60, %v899_v42 }
 0x12e   : > { %v721_v47 = vpop.f32.mrf.mxu2 }
 0x12f   : > { %v1607_v59 = vadd.f32 %v1575_v5, %v1510_v0  ;;  %v1317_v45 = vadd.f32 %v1285_v38, %v1220_v34  ;;  %v722_v50 = vadd.f32 %v2547_v51, %v721_v47 }
 0x130   : > { %v688_v2 = vpop.f32.mrf.mxu0 }
 0x131   : > { %v689_v4 = vadd.f32 %v2547_v51, %v688_v2  ;;  %2160 = vmatmul.msk.f32.gmra.mxu1 %vm518_vm0, %v1735_v63  ;;  %839 = vst.msk [vmem:[#allocation2 + $0xe1] sm:$0xff] %vm518_vm0, %v722_v50 }
 0x132   : > { %v1639_v8 = vld [vmem:[#allocation2 + $0x4a] sm:$0xff]  ;;  %v1640_v26 = vld [vmem:[#allocation2 + $0x52] sm:$0xff] }
 0x133   : > { %v1446_v11 = vld [vmem:[#allocation2 + $0x50] sm:$0xff]  ;;  %828 = vst.msk [vmem:[#allocation2 + $0x61] sm:$0xff] %vm518_vm0, %v689_v4  ;;  %v1672_v16 = vmul.f32 %v2672_v1, %v1639_v8  ;;  %v1673_v31 = vmul.f32 %v2672_v1, %v1640_v26  ;;  %v1382_v39 = vmul.f32 %v1639_v8, %v2646_v32  ;;  %v1383_v48 = vmul.f32 %v1640_v26, %v2646_v32 }
 0x134   : > { %v1543_v13 = vld [vmem:[#allocation2 + $0x51] sm:$0xff]  ;;  %v1479_v18 = vmul.f32 %v2654_v41, %v1446_v11  ;;  %v1189_v27 = vmul.f32 %v1446_v11, %v2623_v17  ;;  %v900_v52 = vmul.f32 %v1446_v11, %v2571_v57  ;;  %v1093_v6 = vmul.f32 %v1639_v8, %v2607_v7 }
 0x135   : > { %v1704_v22 = vadd.f32 %v1672_v16, %v1607_v59  ;;  %v1576_v24 = vmul.f32 %v2664_v56, %v1543_v13  ;;  %v1286_v49 = vmul.f32 %v1543_v13, %v2643_v30  ;;  %v1414_v54 = vadd.f32 %v1382_v39, %v1317_v45 }
 0x136   : > { %v1511_v23 = vadd.f32 %v1479_v18, %v1413_v10  ;;  %v1221_v28 = vadd.f32 %v1189_v27, %v1124_v36  ;;  %v932_v53 = vadd.f32 %v2586_v60, %v900_v52  ;;  %v1028_v59 = vadd.f32 %v996_v3, %v931_v43  ;;  %v724_v21 = vpop.f32.mrf.mxu2 }
 0x137   : > { %v1736_v29 = vmax.f32 %v1704_v22, 0.0  ;;  %v997_v16 = vmul.f32 %v1543_v13, %v2590_v62  ;;  %v725_v9 = vadd.f32 %v2547_v51, %v724_v21  ;;  %v1094_v13 = vmul.f32 %v1640_v26, %v2607_v7 }
 0x138   : > { %v1608_v33 = vadd.f32 %v1576_v24, %v1511_v23  ;;  %v691_v35 = vpop.f32.mrf.mxu0  ;;  %v1318_v61 = vadd.f32 %v1286_v49, %v1221_v28  ;;  %v1125_v25 = vadd.f32 %v1093_v6, %v1028_v59 }
 0x139   : > { %v692_v37 = vadd.f32 %v2547_v51, %v691_v35  ;;  %2161 = vmatmul.msk.f32.gmra.mxu1 %vm518_vm0, %v1736_v29  ;;  %v1029_v8 = vadd.f32 %v997_v16, %v932_v53  ;;  %840 = vst.msk [vmem:[#allocation2 + $0xf1] sm:$0xff] %vm518_vm0, %v725_v9 }
 0x13a   : > { %v1447_v40 = vld [vmem:[#allocation2 + $0x60] sm:$0xff]  ;;  %v1705_v44 = vadd.f32 %v1673_v31, %v1608_v33  ;;  %v1415_v11 = vadd.f32 %v1383_v48, %v1318_v61 }
 0x13b   : > { %829 = vst.msk [vmem:[#allocation2 + $0x69] sm:$0xff] %vm518_vm0, %v692_v37  ;;  %v1480_v46 = vmul.f32 %v2654_v41, %v1447_v40  ;;  %v2738_v58 = vld [vmem:[#allocation2 + $0x61] sm:$0xff]  ;;  %v1190_v20 = vmul.f32 %v1447_v40, %v2623_v17  ;;  %v1126_v36 = vadd.f32 %v1094_v13, %v1029_v8  ;;  %v901_v42 = vmul.f32 %v1447_v40, %v2571_v57 }
 0x13c   : > { %v1737_v63 = vmax.f32 %v1705_v44, 0.0  ;;  %v1577_v5 = vmul.f32 %v2664_v56, %v2738_v58  ;;  %v1287_v38 = vmul.f32 %v2738_v58, %v2643_v30  ;;  %v998_v3 = vmul.f32 %v2738_v58, %v2590_v62 }
 0x13d   : > { %v1512_v0 = vadd.f32 %v1480_v46, %v1414_v54  ;;  %v1222_v34 = vadd.f32 %v1190_v20, %v1125_v25  ;;  %v933_v40 = vadd.f32 %v2586_v60, %v901_v42 }
 0x13e   : > { %v727_v47 = vpop.f32.mrf.mxu2 }
 0x13f   : > { %v1609_v55 = vadd.f32 %v1577_v5, %v1512_v0  ;;  %v1319_v45 = vadd.f32 %v1287_v38, %v1222_v34  ;;  %v728_v50 = vadd.f32 %v2547_v51, %v727_v47 }
 0x140   : > { %v694_v2 = vpop.f32.mrf.mxu0 }
 0x141   : > { %v695_v4 = vadd.f32 %v2547_v51, %v694_v2  ;;  %2162 = vmatmul.msk.f32.gmra.mxu1 %vm518_vm0, %v1737_v63  ;;  %841 = vst.msk [vmem:[#allocation2 + $0xf9] sm:$0xff] %vm518_vm0, %v728_v50 }
 0x142   : > { %v1641_v10 = vld [vmem:[#allocation2 + $0x62] sm:$0xff]  ;;  %v1642_v12 = vld [vmem:[#allocation2 + $0x6a] sm:$0xff] }
 0x143   : > { %v1448_v14 = vld [vmem:[#allocation2 + $0x68] sm:$0xff]  ;;  %830 = vst.msk [vmem:[#allocation2 + $0x79] sm:$0xff] %vm518_vm0, %v695_v4  ;;  %v1674_v18 = vmul.f32 %v2672_v1, %v1641_v10  ;;  %v1675_v31 = vmul.f32 %v2672_v1, %v1642_v12  ;;  %v1384_v39 = vmul.f32 %v1641_v10, %v2646_v32  ;;  %v1385_v48 = vmul.f32 %v1642_v12, %v2646_v32 }
 0x144   : > { %v1545_v15 = vld [vmem:[#allocation2 + $0x69] sm:$0xff]  ;;  %v1481_v19 = vmul.f32 %v2654_v41, %v1448_v14  ;;  %v1191_v27 = vmul.f32 %v1448_v14, %v2623_v17  ;;  %v902_v52 = vmul.f32 %v1448_v14, %v2571_v57  ;;  %v1095_v6 = vmul.f32 %v1641_v10, %v2607_v7 }
 0x145   : > { %v1706_v22 = vadd.f32 %v1674_v18, %v1609_v55  ;;  %v1578_v24 = vmul.f32 %v2664_v56, %v1545_v15  ;;  %v1288_v49 = vmul.f32 %v1545_v15, %v2643_v30  ;;  %v1416_v54 = vadd.f32 %v1384_v39, %v1319_v45 }
 0x146   : > { %v1513_v23 = vadd.f32 %v1481_v19, %v1415_v11  ;;  %v1223_v26 = vadd.f32 %v1191_v27, %v1126_v36  ;;  %v934_v53 = vadd.f32 %v2586_v60, %v902_v52  ;;  %v1030_v55 = vadd.f32 %v998_v3, %v933_v40  ;;  %v730_v9 = vpop.f32.mrf.mxu2 }
 0x147   : > { %v1738_v29 = vmax.f32 %v1706_v22, 0.0  ;;  %v999_v18 = vmul.f32 %v1545_v15, %v2590_v62  ;;  %v731_v8 = vadd.f32 %v2547_v51, %v730_v9  ;;  %v1096_v15 = vmul.f32 %v1642_v12, %v2607_v7 }
 0x148   : > { %v1610_v33 = vadd.f32 %v1578_v24, %v1513_v23  ;;  %v697_v35 = vpop.f32.mrf.mxu0  ;;  %v1320_v43 = vadd.f32 %v1288_v49, %v1223_v26  ;;  %v1127_v25 = vadd.f32 %v1095_v6, %v1030_v55 }
 0x149   : > { %v698_v37 = vadd.f32 %v2547_v51, %v697_v35  ;;  %2163 = vmatmul.msk.f32.gmra.mxu1 %vm518_vm0, %v1738_v29  ;;  %v1031_v10 = vadd.f32 %v999_v18, %v934_v53  ;;  %842 = vst.msk [vmem:[#allocation2 + $0x109] sm:$0xff] %vm518_vm0, %v731_v8 }
 0x14a   : > { %v1449_v28 = vld [vmem:[#allocation2 + $0x78] sm:$0xff]  ;;  %v1707_v44 = vadd.f32 %v1675_v31, %v1610_v33  ;;  %v1417_v14 = vadd.f32 %v1385_v48, %v1320_v43 }
 0x14b   : > { %831 = vst.msk [vmem:[#allocation2 + $0x81] sm:$0xff] %vm518_vm0, %v698_v37  ;;  %v1482_v46 = vmul.f32 %v2654_v41, %v1449_v28  ;;  %v2773_v61 = vld [vmem:[#allocation2 + $0x79] sm:$0xff]  ;;  %v1192_v21 = vmul.f32 %v1449_v28, %v2623_v17  ;;  %v1128_v36 = vadd.f32 %v1096_v15, %v1031_v10  ;;  %v903_v42 = vmul.f32 %v1449_v28, %v2571_v57 }
 0x14c   : > { %v1739_v63 = vmax.f32 %v1707_v44, 0.0  ;;  %v1579_v5 = vmul.f32 %v2664_v56, %v2773_v61  ;;  %v1289_v38 = vmul.f32 %v2773_v61, %v2643_v30  ;;  %v1000_v3 = vmul.f32 %v2773_v61, %v2590_v62 }
 0x14d   : > { %v1514_v0 = vadd.f32 %v1482_v46, %v1416_v54  ;;  %v1224_v34 = vadd.f32 %v1192_v21, %v1127_v25  ;;  %v935_v28 = vadd.f32 %v2586_v60, %v903_v42  ;;  %v1167_v42 = vld [vmem:[#allocation2 + $0xd8] sm:$0xff] }
 0x14e   : > { %v733_v47 = vpop.f32.mrf.mxu2 }
 0x14f   : > { %v1611_v58 = vadd.f32 %v1579_v5, %v1514_v0  ;;  %v1321_v45 = vadd.f32 %v1289_v38, %v1224_v34  ;;  %v734_v50 = vadd.f32 %v2547_v51, %v733_v47 }
 0x150   : > { %v700_v2 = vpop.f32.mrf.mxu0 }
 0x151   : > { %v701_v4 = vadd.f32 %v2547_v51, %v700_v2  ;;  %2164 = vmatmul.msk.f32.gmra.mxu1 %vm518_vm0, %v1739_v63  ;;  %843 = vst.msk [vmem:[#allocation2 + $0x111] sm:$0xff] %vm518_vm0, %v734_v50 }
 0x152   : > { %v1643_v11 = vld [vmem:[#allocation2 + $0x7a] sm:$0xff]  ;;  %v1644_v13 = vld [vmem:[#allocation2 + $0x82] sm:$0xff] }
 0x153   : > { %v1450_v59 = vld [vmem:[#allocation2 + $0x80] sm:$0xff]  ;;  %832 = vst.msk [vmem:[#allocation2 + $0x91] sm:$0xff] %vm518_vm0, %v701_v4  ;;  %v1676_v19 = vmul.f32 %v2672_v1, %v1643_v11  ;;  %v1677_v31 = vmul.f32 %v2672_v1, %v1644_v13  ;;  %v1386_v39 = vmul.f32 %v1643_v11, %v2646_v32  ;;  %v1387_v48 = vmul.f32 %v1644_v13, %v2646_v32 }
 0x154   : > { %v1547_v16 = vld [vmem:[#allocation2 + $0x81] sm:$0xff]  ;;  %v1483_v20 = vmul.f32 %v2654_v41, %v1450_v59  ;;  %v1193_v27 = vmul.f32 %v1450_v59, %v2623_v17  ;;  %v904_v54 = vmul.f32 %v1450_v59, %v2571_v57  ;;  %v1097_v53 = vmul.f32 %v1643_v11, %v2607_v7 }
 0x155   : > { %v1708_v22 = vadd.f32 %v1676_v19, %v1611_v58  ;;  %v1580_v24 = vmul.f32 %v2664_v56, %v1547_v16  ;;  %v1290_v49 = vmul.f32 %v1547_v16, %v2643_v30  ;;  %v1418_v52 = vadd.f32 %v1386_v39, %v1321_v45 }
 0x156   : > { %v1515_v23 = vadd.f32 %v1483_v20, %v1417_v14  ;;  %v1225_v12 = vadd.f32 %v1193_v27, %v1128_v36  ;;  %v936_v6 = vadd.f32 %v2586_v60, %v904_v54  ;;  %v1032_v58 = vadd.f32 %v1000_v3, %v935_v28  ;;  %v736_v9 = vpop.f32.mrf.mxu2  ;;  %v2848_v54 = vld [vmem:[#allocation2 + $0xda] sm:$0xff] }
 0x157   : > { %v1740_v29 = vmax.f32 %v1708_v22, 0.0  ;;  %v1001_v19 = vmul.f32 %v1547_v16, %v2590_v62  ;;  %v737_v10 = vadd.f32 %v2547_v51, %v736_v9  ;;  %v1098_v15 = vmul.f32 %v1644_v13, %v2607_v7  ;;  %v2884_v9 = vld [vmem:[#allocation2 + $0xe0] sm:$0xff] }
 0x158   : > { %v1612_v33 = vadd.f32 %v1580_v24, %v1515_v23  ;;  %v703_v35 = vpop.f32.mrf.mxu0  ;;  %v1322_v40 = vadd.f32 %v1290_v49, %v1225_v12  ;;  %v1129_v8 = vadd.f32 %v1097_v53, %v1032_v58  ;;  %v2858_v3 = vmul.f32 %v2623_v17, %v1167_v42 }
 0x159   : > { %v704_v37 = vadd.f32 %v2547_v51, %v703_v35  ;;  %2165 = vmatmul.msk.f32.gmra.mxu1 %vm518_vm0, %v1740_v29  ;;  %v1033_v25 = vadd.f32 %v1001_v19, %v936_v6  ;;  %844 = vst.msk [vmem:[#allocation2 + $0x121] sm:$0xff] %vm518_vm0, %v737_v10 }
 0x15a   : > { %v1451_v26 = vld [vmem:[#allocation2 + $0x90] sm:$0xff]  ;;  %v1709_v44 = vadd.f32 %v1677_v31, %v1612_v33  ;;  %v1419_v59 = vadd.f32 %v1387_v48, %v1322_v40 }
 0x15b   : > { %833 = vst.msk [vmem:[#allocation2 + $0x99] sm:$0xff] %vm518_vm0, %v704_v37  ;;  %v1484_v46 = vmul.f32 %v2654_v41, %v1451_v26  ;;  %v2808_v43 = vld [vmem:[#allocation2 + $0x91] sm:$0xff]  ;;  %v1194_v21 = vmul.f32 %v1451_v26, %v2623_v17  ;;  %v1130_v39 = vadd.f32 %v1098_v15, %v1033_v25  ;;  %v905_v12 = vmul.f32 %v1451_v26, %v2571_v57  ;;  %v1264_v26 = vld [vmem:[#allocation2 + $0xd9] sm:$0xff] }
 0x15c   : > { %v1741_v63 = vmax.f32 %v1709_v44, 0.0  ;;  %v1581_v5 = vmul.f32 %v2664_v56, %v2808_v43  ;;  %v1291_v36 = vmul.f32 %v2808_v43, %v2643_v30  ;;  %v1002_v48 = vmul.f32 %v2808_v43, %v2590_v62 }
 0x15d   : > { %v1516_v0 = vadd.f32 %v1484_v46, %v1418_v52  ;;  %v1226_v33 = vadd.f32 %v1194_v21, %v1129_v8  ;;  %v2861_v53 = vmul.f32 %v2643_v30, %v1264_v26  ;;  %v2870_v43 = vmul.f32 %v2654_v41, %v1167_v42 }
 0x15e   : > { %v739_v49 = vpop.f32.mrf.mxu2 }
 0x15f   : > { %v1613_v61 = vadd.f32 %v1581_v5, %v1516_v0  ;;  %v1323_v45 = vadd.f32 %v1291_v36, %v1226_v33  ;;  %v740_v50 = vadd.f32 %v2547_v51, %v739_v49 }
 0x160   : > { %v706_v2 = vpop.f32.mrf.mxu0 }
 0x161   : > { %v707_v4 = vadd.f32 %v2547_v51, %v706_v2  ;;  %2166 = vmatmul.msk.f32.gmra.mxu1 %vm518_vm0, %v1741_v63  ;;  %v911_v63 = vmul.f32 %v1167_v42, %v2571_v57  ;;  %845 = vst.msk [vmem:[#allocation2 + $0x129] sm:$0xff] %vm518_vm0, %v740_v50  ;;  %v937_v2 = vadd.f32 %v2586_v60, %v905_v12 }
 0x162   : > { %v1645_v14 = vld [vmem:[#allocation2 + $0x92] sm:$0xff]  ;;  %v2831_v16 = vld [vmem:[#allocation2 + $0x9a] sm:$0xff] }
 0x163   : > { %v1452_v55 = vld [vmem:[#allocation2 + $0x98] sm:$0xff]  ;;  %834 = vst.msk [vmem:[#allocation2 + $0xa9] sm:$0xff] %vm518_vm0, %v707_v4  ;;  %v1678_v11 = vmul.f32 %v2672_v1, %v1645_v14  ;;  %v1679_v31 = vmul.f32 %v2672_v1, %v2831_v16  ;;  %v1388_v38 = vmul.f32 %v1645_v14, %v2646_v32  ;;  %v1099_v58 = vmul.f32 %v1645_v14, %v2607_v7 }
 0x164   : > { %v2821_v18 = vld [vmem:[#allocation2 + $0x99] sm:$0xff]  ;;  %v1485_v20 = vmul.f32 %v2654_v41, %v1452_v55  ;;  %v1195_v34 = vmul.f32 %v1452_v55, %v2623_v17  ;;  %v906_v52 = vmul.f32 %v1452_v55, %v2571_v57  ;;  %v1389_v21 = vmul.f32 %v2831_v16, %v2646_v32 }
 0x165   : > { %v1710_v22 = vadd.f32 %v1678_v11, %v1613_v61  ;;  %v1582_v24 = vmul.f32 %v2664_v56, %v2821_v18  ;;  %v1420_v40 = vadd.f32 %v1388_v38, %v1323_v45  ;;  %v1292_v28 = vmul.f32 %v2821_v18, %v2643_v30 }
 0x166   : > { %v1517_v23 = vadd.f32 %v1485_v20, %v1419_v59  ;;  %v1227_v47 = vadd.f32 %v1195_v34, %v1130_v39  ;;  %v2865_v59 = vmul.f32 %v2646_v32, %v2848_v54  ;;  %v938_v19 = vadd.f32 %v2586_v60, %v906_v52 }
 0x167   : > { %v1742_v27 = vmax.f32 %v1710_v22, 0.0  ;;  %v2873_v61 = vmul.f32 %v2664_v56, %v1264_v26  ;;  %v2882_v14 = vmul.f32 %v2672_v1, %v2848_v54  ;;  %v1003_v25 = vmul.f32 %v2821_v18, %v2590_v62 }
 0x168   : > { %v1614_v29 = vadd.f32 %v1582_v24, %v1517_v23  ;;  %v709_v35 = vpop.f32.mrf.mxu0  ;;  %v1324_v6 = vadd.f32 %v1292_v28, %v1227_v47  ;;  %v1034_v23 = vadd.f32 %v1002_v48, %v937_v2  ;;  %v2898_v38 = vmul.f32 %v2623_v17, %v2884_v9  ;;  %v2909_v47 = vld [vmem:[#allocation2 + $0xf0] sm:$0xff] }
 0x169   : > { %v710_v37 = vadd.f32 %v2547_v51, %v709_v35  ;;  %2167 = vmatmul.msk.f32.gmra.mxu1 %vm518_vm0, %v1742_v27  ;;  %v742_v35 = vpop.f32.mrf.mxu2  ;;  %v943_v12 = vadd.f32 %v2586_v60, %v911_v63  ;;  %v1100_v45 = vmul.f32 %v2831_v16, %v2607_v7  ;;  %v1008_v28 = vmul.f32 %v1264_v26, %v2590_v62 }
 0x16a   : > { %v1453_v13 = vld [vmem:[#allocation2 + $0xa8] sm:$0xff]  ;;  %v1711_v44 = vadd.f32 %v1679_v31, %v1614_v29  ;;  %v1421_v33 = vadd.f32 %v1389_v21, %v1324_v6  ;;  %v1131_v36 = vadd.f32 %v1099_v58, %v1034_v23  ;;  %v1035_v31 = vadd.f32 %v1003_v25, %v938_v19 }
 0x16b   : > { %835 = vst.msk [vmem:[#allocation2 + $0xb1] sm:$0xff] %vm518_vm0, %v710_v37  ;;  %v1486_v46 = vmul.f32 %v2654_v41, %v1453_v13  ;;  %v1550_v0 = vld [vmem:[#allocation2 + $0xa9] sm:$0xff]  ;;  %v1196_v24 = vmul.f32 %v1453_v13, %v2623_v17  ;;  %v907_v15 = vmul.f32 %v1453_v13, %v2571_v57  ;;  %v743_v37 = vadd.f32 %v2547_v51, %v742_v35 }
 0x16c   : > { %v1743_v4 = vmax.f32 %v1711_v44, 0.0  ;;  %v1583_v20 = vmul.f32 %v2664_v56, %v1550_v0  ;;  %v1132_v48 = vadd.f32 %v1100_v45, %v1035_v31  ;;  %v2925_v26 = vmul.f32 %v2909_v47, %v2623_v17 }
 0x16d   : > { %v1518_v5 = vadd.f32 %v1486_v46, %v1420_v40  ;;  %v1228_v44 = vadd.f32 %v1196_v24, %v1131_v36  ;;  %846 = vst.msk [vmem:[#allocation2 + $0x139] sm:$0xff] %vm518_vm0, %v743_v37  ;;  %v939_v49 = vadd.f32 %v2586_v60, %v907_v15  ;;  %v1293_v40 = vmul.f32 %v1550_v0, %v2643_v30 }
 0x16e   : > { %v1040_v36 = vadd.f32 %v1008_v28, %v943_v12  ;;  %v912_v31 = vmul.f32 %v2884_v9, %v2571_v57 }
 0x16f   : > { %v1615_v27 = vadd.f32 %v1583_v20, %v1518_v5  ;;  %v1325_v58 = vadd.f32 %v1293_v40, %v1228_v44 }
 0x170   : > { %v712_v55 = vpop.f32.mrf.mxu0 }
 0x171   : > { %v713_v11 = vadd.f32 %v2547_v51, %v712_v55  ;;  %2168 = vmatmul.msk.f32.gmra.mxu1 %vm518_vm0, %v1743_v4  ;;  %v1004_v4 = vmul.f32 %v1550_v0, %v2590_v62  ;;  %v1105_v55 = vmul.f32 %v2848_v54, %v2607_v7  ;;  %v2927_v0 = vld [vmem:[#allocation2 + $0xf1] sm:$0xff]  ;;  %v745_v15 = vpop.f32.mrf.mxu2 }
 0x172   : > { %v1647_v8 = vld [vmem:[#allocation2 + $0xaa] sm:$0xff]  ;;  %v2903_v42 = vld [vmem:[#allocation2 + $0xb2] sm:$0xff]  ;;  %v2944_v37 = vmul.f32 %v2927_v0, %v2643_v30 }
 0x173   : > { %v1454_v10 = vld [vmem:[#allocation2 + $0xb0] sm:$0xff]  ;;  %836 = vst.msk [vmem:[#allocation2 + $0xc1] sm:$0xff] %vm518_vm0, %v713_v11  ;;  %v1680_v29 = vmul.f32 %v2672_v1, %v1647_v8  ;;  %v1390_v2 = vmul.f32 %v1647_v8, %v2646_v32  ;;  %v1681_v6 = vmul.f32 %v2672_v1, %v2903_v42  ;;  %v1036_v20 = vadd.f32 %v1004_v4, %v939_v49 }
 0x174   : > { %v2886_v22 = vld [vmem:[#allocation2 + $0xb1] sm:$0xff]  ;;  %v1487_v34 = vmul.f32 %v2654_v41, %v1454_v10  ;;  %v1197_v46 = vmul.f32 %v1454_v10, %v2623_v17  ;;  %v908_v16 = vmul.f32 %v1454_v10, %v2571_v57  ;;  %v1101_v21 = vmul.f32 %v1647_v8, %v2607_v7  ;;  %v2930_v10 = vld [vmem:[#allocation2 + $0xe1] sm:$0xff] }
 0x175   : > { %v1712_v18 = vadd.f32 %v1680_v29, %v1615_v27  ;;  %v1584_v13 = vmul.f32 %v2664_v56, %v2886_v22  ;;  %v1294_v54 = vmul.f32 %v2886_v22, %v2643_v30  ;;  %v1422_v27 = vadd.f32 %v1390_v2, %v1325_v58 }
 0x176   : > { %v1519_v39 = vadd.f32 %v1487_v34, %v1421_v33  ;;  %v1229_v11 = vadd.f32 %v1197_v46, %v1132_v48  ;;  %v746_v29 = vadd.f32 %v2547_v51, %v745_v15  ;;  %v2939_v34 = vld [vmem:[#allocation2 + $0xe2] sm:$0xff]  ;;  %v940_v8 = vadd.f32 %v2586_v60, %v908_v16 }
 0x177   : > { %v1744_v50 = vmax.f32 %v1712_v18, 0.0  ;;  %v1009_v18 = vmul.f32 %v2930_v10, %v2590_v62  ;;  %v1005_v44 = vmul.f32 %v2886_v22, %v2590_v62  ;;  %v2956_v46 = vmul.f32 %v2643_v30, %v2930_v10 }
 0x178   : > { %v1616_v52 = vadd.f32 %v1584_v13, %v1519_v39  ;;  %v715_v63 = vpop.f32.mrf.mxu0  ;;  %847 = vst.msk [vmem:[#allocation2 + $0x141] sm:$0xff] %vm518_vm0, %v746_v29  ;;  %v1133_v13 = vadd.f32 %v1101_v21, %v1036_v20  ;;  %v2960_v49 = vmul.f32 %v2939_v34, %v2607_v7  ;;  %v1137_v2 = vadd.f32 %v1105_v55, %v1040_v36  ;;  %v2981_v36 = vld [vmem:[#allocation2 + $0xf2] sm:$0xff] }
 0x179   : > { %v716_v5 = vadd.f32 %v2547_v51, %v715_v63  ;;  %2169 = vmatmul.msk.f32.gmra.mxu1 %vm518_vm0, %v1744_v50  ;;  %v1326_v51 = vadd.f32 %v1294_v54, %v1229_v11  ;;  %v1037_v28 = vadd.f32 %v1005_v44, %v940_v8  ;;  %v2969_v63 = vmul.f32 %v2646_v32, %v2939_v34  ;;  %v748_v55 = vpop.f32.mrf.mxu2 }
 0x17a   : > { %v1455_v19 = vld [vmem:[#allocation2 + $0xc0] sm:$0xff]  ;;  %v1713_v23 = vadd.f32 %v1681_v6, %v1616_v52  ;;  %v1391_v52 = vmul.f32 %v2903_v42, %v2646_v32  ;;  %v944_v48 = vadd.f32 %v2586_v60, %v912_v31  ;;  %v1102_v11 = vmul.f32 %v2903_v42, %v2607_v7 }
 0x17b   : > { %837 = vst.msk [vmem:[#allocation2 + $0xc9] sm:$0xff] %vm518_vm0, %v716_v5  ;;  %v1488_v24 = vmul.f32 %v2654_v41, %v1455_v19  ;;  %v909_v25 = vmul.f32 %v1455_v19, %v2571_v57  ;;  %v1198_v33 = vmul.f32 %v1455_v19, %v2623_v17  ;;  %v1552_v35 = vld [vmem:[#allocation2 + $0xc1] sm:$0xff] }
 0x17c   : > { %v1745_v45 = vmax.f32 %v1713_v23, 0.0  ;;  %v1585_v50 = vmul.f32 %v2664_v56, %v1552_v35  ;;  %v1006_v22 = vmul.f32 %v1552_v35, %v2590_v62  ;;  %v1423_v5 = vadd.f32 %v1391_v52, %v1326_v51  ;;  %v2988_v51 = vld [vmem:[%s3343_s3] ss:$0 sm:$0xff] }
 0x17d   : > { %v1520_v39 = vadd.f32 %v1488_v24, %v1422_v27  ;;  %v941_v12 = vadd.f32 %v2586_v60, %v909_v25  ;;  %v1230_v40 = vadd.f32 %v1198_v33, %v1133_v13  ;;  %v1295_v19 = vmul.f32 %v1552_v35, %v2643_v30 }
 0x17e   : > { %v1134_v27 = vadd.f32 %v1102_v11, %v1037_v28  ;;  %v749_v13 = vadd.f32 %v2988_v51, %v748_v55  ;;  %v1460_v11 = vld [vmem:[#allocation2 + $0xf8] sm:$0xff] }
 0x17f   : > { %v1617_v4 = vadd.f32 %v1585_v50, %v1520_v39  ;;  %v1038_v23 = vadd.f32 %v1006_v22, %v941_v12  ;;  %v1327_v54 = vadd.f32 %v1295_v19, %v1230_v40  ;;  %v1396_v22 = vmul.f32 %v2981_v36, %v2646_v32 }
 0x180   : > { %848 = vst.msk [vmem:[#allocation2 + $0x151] sm:$0xff] %vm518_vm0, %v749_v13 }
 0x181   : > { %2170 = vmatmul.msk.f32.gmra.mxu1 %vm518_vm0, %v1745_v45 }
 0x182   : > { %v1649_v16 = vld [vmem:[#allocation2 + $0xc2] sm:$0xff]  ;;  %v1650_v35 = vld [vmem:[#allocation2 + $0xca] sm:$0xff] }
 0x183   : > { %v1456_v6 = vld [vmem:[#allocation2 + $0xc8] sm:$0xff]  ;;  %v1682_v20 = vmul.f32 %v2672_v1, %v1649_v16  ;;  %v1103_v24 = vmul.f32 %v1649_v16, %v2607_v7  ;;  %v1392_v25 = vmul.f32 %v1649_v16, %v2646_v32  ;;  %v1104_v28 = vmul.f32 %v1650_v35, %v2607_v7 }
 0x184   : > { %v1553_v58 = vld [vmem:[#allocation2 + $0xc9] sm:$0xff]  ;;  %v1489_v21 = vmul.f32 %v2654_v41, %v1456_v6  ;;  %v910_v15 = vmul.f32 %v1456_v6, %v2571_v57  ;;  %v1199_v44 = vmul.f32 %v1456_v6, %v2623_v17  ;;  %v1041_v6 = vadd.f32 %v1009_v18, %v944_v48 }
 0x185   : > { %v1714_v29 = vadd.f32 %v1682_v20, %v1617_v4  ;;  %v1586_v8 = vmul.f32 %v2664_v56, %v1553_v58  ;;  %v1135_v42 = vadd.f32 %v1103_v24, %v1038_v23  ;;  %v1007_v39 = vmul.f32 %v1553_v58, %v2590_v62 }
 0x186   : > { %v1521_v33 = vadd.f32 %v1489_v21, %v1423_v5  ;;  %v942_v31 = vadd.f32 %v2586_v60, %v910_v15  ;;  %v1424_v52 = vadd.f32 %v1392_v25, %v1327_v54  ;;  %v1231_v60 = vadd.f32 %v1199_v44, %v1134_v27  ;;  %v1461_v25 = vld [vmem:[#allocation2 + $0x108] sm:$0xff]  ;;  %v1557_v27 = vld [vmem:[#allocation2 + $0xf9] sm:$0xff] }
 0x187   : > { %v1746_v45 = vmax.f32 %v1714_v29, 0.0  ;;  %v1232_v50 = vadd.f32 %v2858_v3, %v1135_v42  ;;  %v1683_v4 = vmul.f32 %v2672_v1, %v1650_v35  ;;  %v1296_v5 = vmul.f32 %v1553_v58, %v2643_v30 }
 0x188   : > { %v1618_v12 = vadd.f32 %v1586_v8, %v1521_v33  ;;  %v1039_v40 = vadd.f32 %v1007_v39, %v942_v31  ;;  %v1492_v3 = vmul.f32 %v2654_v41, %v2909_v47  ;;  %v1234_v20 = vadd.f32 %v2925_v26, %v1137_v2 }
 0x189   : > { %2171 = vmatmul.msk.f32.gmra.mxu1 %vm518_vm0, %v1746_v45  ;;  %v1329_v16 = vadd.f32 %v2861_v53, %v1232_v50  ;;  %v913_v21 = vmul.f32 %v2909_v47, %v2571_v57  ;;  %v1522_v55 = vadd.f32 %v2870_v43, %v1424_v52  ;;  %v1328_v54 = vadd.f32 %v1296_v5, %v1231_v60  ;;  %v751_v53 = vpop.f32.mrf.mxu2 }
 0x18a   : > { %v1136_v19 = vadd.f32 %v1104_v28, %v1039_v40  ;;  %v1715_v23 = vadd.f32 %v1683_v4, %v1618_v12  ;;  %v1589_v18 = vmul.f32 %v2664_v56, %v2927_v0  ;;  %v1686_v48 = vmul.f32 %v2672_v1, %v2981_v36  ;;  %v1558_v40 = vld [vmem:[#allocation2 + $0x109] sm:$0xff] }
 0x18b   : > { %v1426_v24 = vadd.f32 %v2865_v59, %v1329_v16  ;;  %v752_v26 = vadd.f32 %v2988_v51, %v751_v53  ;;  %v1393_v47 = vmul.f32 %v1650_v35, %v2646_v32  ;;  %v1138_v59 = vadd.f32 %v2960_v49, %v1041_v6 }
 0x18c   : > { %v1233_v58 = vadd.f32 %v2898_v38, %v1136_v19  ;;  %v1203_v43 = vmul.f32 %v1460_v11, %v2623_v17  ;;  %v1331_v29 = vadd.f32 %v2944_v37, %v1234_v20  ;;  %v3023_v38 = vld [vmem:[%s3345_s5] ss:$0 sm:$0xff]  ;;  %v1010_v8 = vmul.f32 %v2927_v0, %v2590_v62 }
 0x18d   : > { %v1524_v2 = vadd.f32 %v1492_v3, %v1426_v24  ;;  %849 = vst.msk [vmem:[#allocation2 + $0x159] sm:$0xff] %vm518_vm0, %v752_v26  ;;  %v945_v33 = vadd.f32 %v3023_v38, %v913_v21  ;;  %v1747_v49 = vmax.f32 %v1715_v23, 0.0  ;;  %v1619_v42 = vadd.f32 %v2873_v61, %v1522_v55  ;;  %v1654_v61 = vld [vmem:[#allocation2 + $0xfa] sm:$0xff]  ;;  %v1462_v23 = vld [vmem:[#allocation2 + $0x110] sm:$0xff] }
 0x18e   : > { %v1330_v15 = vadd.f32 %v2956_v46, %v1233_v58  ;;  %v1425_v46 = vadd.f32 %v1393_v47, %v1328_v54  ;;  %v1493_v37 = vmul.f32 %v2654_v41, %v1460_v11  ;;  %v1491_v39 = vmul.f32 %v2654_v41, %v2884_v9 }
 0x18f   : > { %v1621_v35 = vadd.f32 %v1589_v18, %v1524_v2  ;;  %v1494_v13 = vmul.f32 %v2654_v41, %v1461_v25  ;;  %v1590_v45 = vmul.f32 %v2664_v56, %v1557_v27  ;;  %v1235_v0 = vadd.f32 %v1203_v43, %v1138_v59  ;;  %v1559_v43 = vld [vmem:[#allocation2 + $0x111] sm:$0xff] }
 0x190   : > { %v1427_v31 = vadd.f32 %v2969_v63, %v1330_v15  ;;  %v1300_v12 = vmul.f32 %v1557_v27, %v2643_v30  ;;  %v1428_v52 = vadd.f32 %v1396_v22, %v1331_v29  ;;  %v1107_v63 = vmul.f32 %v2981_v36, %v2607_v7 }
 0x191   : > { %2172 = vmatmul.msk.f32.gmra.mxu1 %vm518_vm0, %v1747_v49  ;;  %v1718_v44 = vadd.f32 %v1686_v48, %v1621_v35  ;;  %v914_v28 = vmul.f32 %v1460_v11, %v2571_v57  ;;  %v1716_v60 = vadd.f32 %v2882_v14, %v1619_v42  ;;  %v1523_v4 = vadd.f32 %v1491_v39, %v1425_v46  ;;  %v754_v16 = vpop.f32.mrf.mxu2  ;;  %v1655_v14 = vld [vmem:[#allocation2 + $0x10a] sm:$0xff] }
 0x192   : > { %v1525_v50 = vadd.f32 %v1493_v37, %v1427_v31  ;;  %v1042_v5 = vadd.f32 %v1010_v8, %v945_v33  ;;  %v1588_v3 = vmul.f32 %v2664_v56, %v2930_v10  ;;  %v755_v19 = vadd.f32 %v2988_v51, %v754_v16  ;;  %v1656_v31 = vld [vmem:[#allocation2 + $0x112] sm:$0xff] }
 0x193   : > { %v1750_v9 = vmax.f32 %v1718_v44, 0.0  ;;  %v1687_v22 = vmul.f32 %v2672_v1, %v1654_v61  ;;  %v1591_v36 = vmul.f32 %v2664_v56, %v1558_v40  ;;  %v1332_v20 = vadd.f32 %v1300_v12, %v1235_v0 }
 0x194   : > { %v1622_v6 = vadd.f32 %v1590_v45, %v1525_v50  ;;  %v1397_v11 = vmul.f32 %v1654_v61, %v2646_v32  ;;  %v1526_v21 = vadd.f32 %v1494_v13, %v1428_v52  ;;  %850 = vst.msk [vmem:[#allocation2 + $0x169] sm:$0xff] %vm518_vm0, %v755_v19  ;;  %v1204_v24 = vmul.f32 %v1461_v25, %v2623_v17  ;;  %v1463_v50 = vld [vmem:[#allocation2 + $0x120] sm:$0xff]  ;;  %v3072_v52 = vld [vmem:[%s3344_s4 + $0x8] ss:$0 sm:$0xff] }
 0x195   : > { %2175 = vmatmul.msk.f32.vlgmr.msra.gmra.mxu3 %vm518_vm0, %v1750_v9  ;;  %v946_v10 = vadd.f32 %v3023_v38, %v914_v28  ;;  %v1011_v55 = vmul.f32 %v1557_v27, %v2590_v62  ;;  %v1748_v54 = vmax.f32 %v1716_v60, 0.0  ;;  %v1620_v18 = vadd.f32 %v1588_v3, %v1523_v4  ;;  %v1560_v28 = vld [vmem:[#allocation2 + $0x121] sm:$0xff] }
 0x196   : > { %v1719_v53 = vadd.f32 %v1687_v22, %v1622_v6  ;;  %v1139_v48 = vadd.f32 %v1107_v63, %v1042_v5  ;;  %v1685_v58 = vmul.f32 %v2672_v1, %v2939_v34  ;;  %v1688_v26 = vmul.f32 %v2672_v1, %v1655_v14  ;;  %v3080_v5 = vld [vmem:[%s3347_s7] ss:$0 sm:$0xff] }
 0x197   : > { %v1429_v2 = vadd.f32 %v1397_v11, %v1332_v20  ;;  %v1495_v47 = vmul.f32 %v2654_v41, %v1462_v23  ;;  %v1623_v59 = vadd.f32 %v1591_v36, %v1526_v21  ;;  %v1043_v15 = vadd.f32 %v1011_v55, %v946_v10  ;;  %v1464_v55 = vld [vmem:[#allocation2 + $0x128] sm:$0xff] }
 0x198   : > { %v1108_v29 = vmul.f32 %v1654_v61, %v2607_v7  ;;  %v915_v27 = vmul.f32 %v1461_v25, %v2571_v57  ;;  %v1751_v33 = vmax.f32 %v1719_v53, 0.0  ;;  %v1717_v8 = vadd.f32 %v1685_v58, %v1620_v18 }
 0x199   : > { %2173 = vmatmul.msk.f32.gmra.mxu1 %vm518_vm0, %v1748_v54  ;;  %v1236_v49 = vadd.f32 %v1204_v24, %v1139_v48  ;;  %v1301_v35 = vmul.f32 %v1558_v40, %v2643_v30  ;;  %v757_v42 = vpop.f32.mrf.mxu2  ;;  %v1527_v1 = vadd.f32 %v1495_v47, %v1429_v2  ;;  %v1592_v46 = vmul.f32 %v2664_v56, %v1559_v43 }
 0x19a   : > { %v758_v34 = vadd.f32 %v2988_v51, %v757_v42  ;;  %v1140_v37 = vadd.f32 %v1108_v29, %v1043_v15  ;;  %v1205_v39 = vmul.f32 %v1462_v23, %v2623_v17  ;;  %v947_v25 = vadd.f32 %v3023_v38, %v915_v27  ;;  %v1561_v29 = vld [vmem:[#allocation2 + $0x129] sm:$0xff] }
 0x19b   : > { %v1012_v13 = vmul.f32 %v1558_v40, %v2590_v62  ;;  %v1749_v44 = vmax.f32 %v1717_v8, 0.0  ;;  %v1720_v45 = vadd.f32 %v1688_v26, %v1623_v59  ;;  %v1333_v0 = vadd.f32 %v1301_v35, %v1236_v49  ;;  %v2215_v26 = vld [vmem:[%s2374_s16] sm:$0xff] }
 0x19c   : > { %851 = vst.msk [vmem:[#allocation2 + $0x171] sm:$0xff] %vm518_vm0, %v758_v34  ;;  %v1398_v12 = vmul.f32 %v1655_v14, %v2646_v32  ;;  %v1624_v61 = vadd.f32 %v1592_v46, %v1527_v1  ;;  %v1689_v63 = vmul.f32 %v3072_v52, %v1656_v31  ;;  %v1237_v9 = vadd.f32 %v1205_v39, %v1140_v37 }
 0x19d   : > { %2176 = vmatmul.msk.f32.gmra.mxu3 %vm518_vm0, %v1751_v33  ;;  %v1302_v40 = vmul.f32 %v1559_v43, %v2643_v30  ;;  %v1044_v60 = vadd.f32 %v1012_v13, %v947_v25  ;;  %v1109_v4 = vmul.f32 %v1655_v14, %v2607_v7  ;;  %v1752_v16 = vmax.f32 %v1720_v45, 0.0  ;;  %v1657_v14 = vld [vmem:[#allocation2 + $0x122] sm:$0xff]  ;;  %v1658_v13 = vld [vmem:[#allocation2 + $0x12a] sm:$0xff]  ;;  %v1465_v45 = vld [vmem:[#allocation2 + $0x138] sm:$0xff] }
 0x19e   : > { %v1430_v6 = vadd.f32 %v1398_v12, %v1333_v0  ;;  %v1496_v3 = vmul.f32 %v2654_v41, %v1463_v50  ;;  %v916_v22 = vmul.f32 %v1462_v23, %v2571_v57  ;;  %v1721_v20 = vadd.f32 %v1689_v63, %v1624_v61  ;;  %v2216_v63 = vld [vmem:[%s2374_s16 + $0x8] sm:$0xff] }
 0x19f   : > { %v1593_v11 = vmul.f32 %v2664_v56, %v1560_v28  ;;  %v1334_v24 = vadd.f32 %v1302_v40, %v1237_v9  ;;  %v1399_v10 = vmul.f32 %v1656_v31, %v2646_v32  ;;  %v1141_v54 = vadd.f32 %v1109_v4, %v1044_v60 }
 0x1a0   : > { %v1206_v23 = vmul.f32 %v1463_v50, %v2623_v17  ;;  %v1528_v18 = vadd.f32 %v1496_v3, %v1430_v6  ;;  %v948_v48 = vadd.f32 %v3023_v38, %v916_v22  ;;  %v1013_v58 = vmul.f32 %v1559_v43, %v2590_v62  ;;  %v1562_v6 = vld [vmem:[#allocation2 + $0x139] sm:$0xff] }
 0x1a1   : > { %2174 = vmatmul.msk.f32.gmra.mxu1 %vm518_vm0, %v1749_v44  ;;  %v760_v19 = vpop.f32.mrf.mxu2  ;;  %v1690_v47 = vmul.f32 %v3072_v52, %v1657_v14  ;;  %v1497_v59 = vmul.f32 %v2654_v41, %v1464_v55  ;;  %v1431_v15 = vadd.f32 %v1399_v10, %v1334_v24  ;;  %v1303_v33 = vmul.f32 %v1560_v28, %v2643_v30 }
 0x1a2   : > { %v761_v36 = vadd.f32 %v2988_v51, %v760_v19  ;;  %v1238_v27 = vadd.f32 %v1206_v23, %v1141_v54  ;;  %v917_v8 = vmul.f32 %v1463_v50, %v2571_v57  ;;  %v1753_v43 = vmax.f32 %v1721_v20, 0.0  ;;  %v1659_v23 = vld [vmem:[#allocation2 + $0x13a] sm:$0xff] }
 0x1a3   : > { %v1625_v49 = vadd.f32 %v1593_v11, %v1528_v18  ;;  %v1045_v42 = vadd.f32 %v1013_v58, %v948_v48  ;;  %v1110_v34 = vmul.f32 %v1656_v31, %v2607_v7  ;;  %v1594_v46 = vmul.f32 %v2664_v56, %v1561_v29 }
 0x1a4   : > { %852 = vst.msk [vmem:[#allocation2 + $0x181] sm:$0xff] %vm518_vm0, %v761_v36  ;;  %v1400_v37 = vmul.f32 %v1657_v14, %v2646_v32  ;;  %v1529_v25 = vadd.f32 %v1497_v59, %v1431_v15  ;;  %v1335_v44 = vadd.f32 %v1303_v33, %v1238_v27  ;;  %v949_v0 = vadd.f32 %v3023_v38, %v917_v8  ;;  %v1563_v8 = vld [vmem:[#allocation2 + $0x141] sm:$0xff] }
 0x1a5   : > { %2177 = vmatmul.msk.f32.gmra.mxu3 %vm518_vm0, %v1752_v16  ;;  %v1014_v31 = vmul.f32 %v1560_v28, %v2590_v62  ;;  %v1722_v12 = vadd.f32 %v1690_v47, %v1625_v49  ;;  %v1142_v50 = vadd.f32 %v1110_v34, %v1045_v42  ;;  %v1207_v61 = vmul.f32 %v1464_v55, %v2623_v17 }
 0x1a6   : > { %v1888_v21 = vpop.f32.mrf.mxu1  ;;  %v1691_v40 = vmul.f32 %v3072_v52, %v1658_v13  ;;  %v1498_v60 = vmul.f32 %v2654_v41, %v1465_v45  ;;  %v1626_v4 = vadd.f32 %v1594_v46, %v1529_v25  ;;  %v1432_v16 = vadd.f32 %v1400_v37, %v1335_v44  ;;  %v1660_v25 = vld [vmem:[#allocation2 + $0x142] sm:$0xff] }
 0x1a7   : > { %v1889_v53 = vadd.f32 %v3080_v5, %v1888_v21  ;;  %v1046_v3 = vadd.f32 %v1014_v31, %v949_v0  ;;  %v1111_v19 = vmul.f32 %v1657_v14, %v2607_v7  ;;  %v1754_v28 = vmax.f32 %v1722_v12, 0.0  ;;  %v1466_v14 = vld [vmem:[#allocation2 + $0x140] sm:$0xff]  ;;  %v1467_v0 = vld [vmem:[#allocation2 + $0x150] sm:$0xff] }
 0x1a8   : > { %v1239_v22 = vadd.f32 %v1207_v61, %v1142_v50  ;;  %v1304_v36 = vmul.f32 %v1561_v29, %v2643_v30  ;;  %v918_v20 = vmul.f32 %v1464_v55, %v2571_v57  ;;  %v1595_v11 = vmul.f32 %v2664_v56, %v1562_v6  ;;  %v2218_v61 = vld [vmem:[%s2374_s16 + $0x18] sm:$0xff] }
 0x1a9   : > { %v1984_v2 = vadd.f32 %v2215_v26, %v1889_v53  ;;  %v763_v35 = vpop.f32.mrf.mxu2  ;;  %v1401_v21 = vmul.f32 %v1658_v13, %v2646_v32  ;;  %v1723_v10 = vadd.f32 %v1691_v40, %v1626_v4  ;;  %v1530_v54 = vadd.f32 %v1498_v60, %v1432_v16  ;;  %v1564_v4 = vld [vmem:[#allocation2 + $0x151] sm:$0xff] }
 0x1aa   : > { %v764_v1 = vadd.f32 %v2988_v51, %v763_v35  ;;  %v1143_v53 = vadd.f32 %v1111_v19, %v1046_v3  ;;  %v1208_v18 = vmul.f32 %v1465_v45, %v2623_v17  ;;  %v1336_v58 = vadd.f32 %v1304_v36, %v1239_v22 }
 0x1ab   : > { %2016 = vst.msk [vmem:[%s3097_s18] sm:$0xff] %vm518_vm0, %v1984_v2  ;;  %v950_v55 = vadd.f32 %v3023_v38, %v918_v20  ;;  %v1015_v26 = vmul.f32 %v1561_v29, %v2590_v62  ;;  %v2217_v2 = vld [vmem:[%s2374_s16 + $0x10] sm:$0xff]  ;;  %v1692_v59 = vmul.f32 %v3072_v52, %v1659_v23  ;;  %v1499_v15 = vmul.f32 %v2654_v41, %v1466_v14 }
 0x1ac   : > { %853 = vst.msk [vmem:[#allocation2 + $0x189] sm:$0xff] %vm518_vm0, %v764_v1  ;;  %v1755_v27 = vmax.f32 %v1723_v10, 0.0  ;;  %v1627_v33 = vadd.f32 %v1595_v11, %v1530_v54  ;;  %v1305_v49 = vmul.f32 %v1562_v6, %v2643_v30  ;;  %v1433_v35 = vadd.f32 %v1401_v21, %v1336_v58  ;;  %v1661_v10 = vld [vmem:[#allocation2 + $0x152] sm:$0xff] }
 0x1ad   : > { %2178 = vmatmul.msk.f32.gmra.mxu3 %vm518_vm0, %v1753_v43  ;;  %v1240_v43 = vadd.f32 %v1208_v18, %v1143_v53  ;;  %v1047_v42 = vadd.f32 %v1015_v26, %v950_v55  ;;  %v1112_v34 = vmul.f32 %v1658_v13, %v2607_v7  ;;  %v919_v29 = vmul.f32 %v1465_v45, %v2571_v57  ;;  %v1468_v54 = vld [vmem:[#allocation2 + $0x158] sm:$0xff]  ;;  %v2219_v26 = vld [vmem:[%s2374_s16 + $0x20] sm:$0xff] }
 0x1ae   : > { %v1891_v39 = vpop.f32.mrf.mxu1  ;;  %v1596_v1 = vmul.f32 %v2664_v56, %v1563_v8  ;;  %v1402_v46 = vmul.f32 %v1659_v23, %v2646_v32  ;;  %v1209_v31 = vmul.f32 %v1466_v14, %v2623_v17  ;;  %v1531_v12 = vadd.f32 %v1499_v15, %v1433_v35  ;;  %v1565_v15 = vld [vmem:[#allocation2 + $0x159] sm:$0xff] }
 0x1af   : > { %v1892_v51 = vadd.f32 %v3080_v5, %v1891_v39  ;;  %v1724_v39 = vadd.f32 %v1692_v59, %v1627_v33  ;;  %v1337_v44 = vadd.f32 %v1305_v49, %v1240_v43  ;;  %v1144_v45 = vadd.f32 %v1112_v34, %v1047_v42 }
 0x1b0   : > { %v951_v50 = vadd.f32 %v3023_v38, %v919_v29  ;;  %v1500_v40 = vmul.f32 %v2654_v41, %v1467_v0  ;;  %v1306_v16 = vmul.f32 %v1563_v8, %v2643_v30  ;;  %v1113_v3 = vmul.f32 %v1659_v23, %v2607_v7 }
 0x1b1   : > { %v1985_v9 = vadd.f32 %v2216_v63, %v1892_v51  ;;  %v1016_v51 = vmul.f32 %v1562_v6, %v2590_v62  ;;  %v1434_v60 = vadd.f32 %v1402_v46, %v1337_v44  ;;  %v920_v6 = vmul.f32 %v1466_v14, %v2571_v57 }
 0x1b2   : > { %v1756_v19 = vmax.f32 %v1724_v39, 0.0  ;;  %v1241_v22 = vadd.f32 %v1209_v31, %v1144_v45  ;;  %v1597_v20 = vmul.f32 %v2664_v56, %v1564_v4  ;;  %v1403_v11 = vmul.f32 %v1660_v25, %v2646_v32  ;;  %v1469_v45 = vld [vmem:[#allocation2 + $0x168] sm:$0xff] }
 0x1b3   : > { %2017 = vst.msk [vmem:[%s3097_s18 + $0x8] sm:$0xff] %vm518_vm0, %v1985_v9  ;;  %v1693_v9 = vmul.f32 %v3072_v52, %v1660_v25  ;;  %v1048_v36 = vadd.f32 %v1016_v51, %v951_v50  ;;  %v1210_v23 = vmul.f32 %v1467_v0, %v2623_v17  ;;  %v952_v14 = vadd.f32 %v3023_v38, %v920_v6  ;;  %v2220_v50 = vld [vmem:[%s2374_s16 + $0x28] sm:$0xff] }
 0x1b4   : > { %v1017_v53 = vmul.f32 %v1563_v8, %v2590_v62  ;;  %v1338_v58 = vadd.f32 %v1306_v16, %v1241_v22  ;;  %v1501_v59 = vmul.f32 %v2654_v41, %v1468_v54  ;;  %v1114_v43 = vmul.f32 %v1660_v25, %v2607_v7  ;;  %v1566_v22 = vld [vmem:[#allocation2 + $0x169] sm:$0xff] }
 0x1b5   : > { %2179 = vmatmul.msk.f32.gmra.mxu3 %vm518_vm0, %v1754_v28  ;;  %v1628_v28 = vadd.f32 %v1596_v1, %v1531_v12  ;;  %v1145_v55 = vadd.f32 %v1113_v3, %v1048_v36  ;;  %v921_v49 = vmul.f32 %v1467_v0, %v2571_v57  ;;  %v1598_v29 = vmul.f32 %v2664_v56, %v1565_v15 }
 0x1b6   : > { %v1894_v24 = vpop.f32.mrf.mxu1  ;;  %v1049_v33 = vadd.f32 %v1017_v53, %v952_v14  ;;  %v1435_v42 = vadd.f32 %v1403_v11, %v1338_v58  ;;  %v1404_v1 = vmul.f32 %v1661_v10, %v2646_v32  ;;  %v1211_v25 = vmul.f32 %v1468_v54, %v2623_v17  ;;  %v1663_v58 = vld [vmem:[#allocation2 + $0x16a] sm:$0xff] }
 0x1b7   : > { %v1895_v48 = vadd.f32 %v3080_v5, %v1894_v24  ;;  %v1532_v24 = vadd.f32 %v1500_v40, %v1434_v60  ;;  %v1242_v34 = vadd.f32 %v1210_v23, %v1145_v55  ;;  %v953_v44 = vadd.f32 %v3023_v38, %v921_v49  ;;  %v2221_v55 = vld [vmem:[%s2374_s16 + $0x30] sm:$0xff] }
 0x1b8   : > { %v1146_v39 = vadd.f32 %v1114_v43, %v1049_v33  ;;  %v1018_v0 = vmul.f32 %v1564_v4, %v2590_v62  ;;  %v1115_v16 = vmul.f32 %v1661_v10, %v2607_v7  ;;  %v922_v3 = vmul.f32 %v1468_v54, %v2571_v57 }
 0x1b9   : > { %v1986_v47 = vadd.f32 %v2217_v2, %v1895_v48  ;;  %v1725_v48 = vadd.f32 %v1693_v9, %v1628_v28  ;;  %v1629_v35 = vadd.f32 %v1597_v20, %v1532_v24  ;;  %v1308_v9 = vmul.f32 %v1565_v15, %v2643_v30  ;;  %v1470_v24 = vld [vmem:[#allocation2 + $0x170] sm:$0xff] }
 0x1ba   : > { %v1243_v40 = vadd.f32 %v1211_v25, %v1146_v39  ;;  %v1050_v60 = vadd.f32 %v1018_v0, %v953_v44  ;;  %v1502_v28 = vmul.f32 %v2654_v41, %v1469_v45  ;;  %v1212_v20 = vmul.f32 %v1469_v45, %v2623_v17  ;;  %v1664_v39 = vld [vmem:[#allocation2 + $0x172] sm:$0xff] }
 0x1bb   : > { %2018 = vst.msk [vmem:[%s3097_s18 + $0x10] sm:$0xff] %vm518_vm0, %v1986_v47  ;;  %v1694_v47 = vmul.f32 %v3072_v52, %v1661_v10  ;;  %v1757_v8 = vmax.f32 %v1725_v48, 0.0  ;;  %v954_v54 = vadd.f32 %v3023_v38, %v922_v3  ;;  %v1019_v23 = vmul.f32 %v1565_v15, %v2590_v62 }
 0x1bc   : > { %v1147_v10 = vadd.f32 %v1115_v16, %v1050_v60  ;;  %v1599_v48 = vmul.f32 %v2664_v56, %v1566_v22  ;;  %v1213_v0 = vmul.f32 %v1470_v24, %v2623_v17  ;;  %v1568_v60 = vld [vmem:[#allocation2 + $0x181] sm:$0xff] }
 0x1bd   : > { %2180 = vmatmul.msk.f32.gmra.mxu3 %vm518_vm0, %v1755_v27  ;;  %v1307_v27 = vmul.f32 %v1564_v4, %v2643_v30  ;;  %v1726_v51 = vadd.f32 %v1694_v47, %v1629_v35  ;;  %v1309_v47 = vmul.f32 %v1566_v22, %v2643_v30  ;;  %v1051_v43 = vadd.f32 %v1019_v23, %v954_v54 }
 0x1be   : > { %v1897_v37 = vpop.f32.mrf.mxu1  ;;  %v1244_v33 = vadd.f32 %v1212_v20, %v1147_v10  ;;  %v1696_v35 = vmul.f32 %v3072_v52, %v1663_v58  ;;  %v1665_v10 = vld [vmem:[#allocation2 + $0x182] sm:$0xff] }
 0x1bf   : > { %v1898_v13 = vadd.f32 %v3080_v5, %v1897_v37  ;;  %v1662_v37 = vld [vmem:[#allocation2 + $0x15a] sm:$0xff]  ;;  %v1339_v12 = vadd.f32 %v1307_v27, %v1242_v34  ;;  %v1758_v4 = vmax.f32 %v1726_v51, 0.0  ;;  %v1567_v27 = vld [vmem:[#allocation2 + $0x171] sm:$0xff] }
 0x1c0   : > { %v1405_v36 = vmul.f32 %v1662_v37, %v2646_v32  ;;  %v1116_v49 = vmul.f32 %v1662_v37, %v2607_v7  ;;  %v1600_v34 = vmul.f32 %v2664_v56, %v1567_v27  ;;  %v1341_v25 = vadd.f32 %v1309_v47, %v1244_v33  ;;  %v1569_v33 = vld [vmem:[#allocation2 + $0x189] sm:$0xff] }
 0x1c1   : > { %v1987_v63 = vadd.f32 %v2218_v61, %v1898_v13  ;;  %v1533_v13 = vadd.f32 %v1501_v59, %v1435_v42  ;;  %v923_v42 = vmul.f32 %v1469_v45, %v2571_v57  ;;  %v2222_v45 = vld [vmem:[%s2374_s16 + $0x38] sm:$0xff]  ;;  %v1310_v3 = vmul.f32 %v1567_v27, %v2643_v30 }
 0x1c2   : > { %v1148_v44 = vadd.f32 %v1116_v49, %v1051_v43  ;;  %v1311_v49 = vmul.f32 %v1568_v60, %v2643_v30 }
 0x1c3   : > { %2019 = vst.msk [vmem:[%s3097_s18 + $0x18] sm:$0xff] %vm518_vm0, %v1987_v63  ;;  %v1695_v63 = vmul.f32 %v3072_v52, %v1662_v37  ;;  %v1630_v6 = vadd.f32 %v1598_v29, %v1533_v13  ;;  %v1406_v29 = vmul.f32 %v1663_v58, %v2646_v32  ;;  %v1471_v37 = vld [vmem:[#allocation2 + $0x180] sm:$0xff]  ;;  %v955_v13 = vadd.f32 %v3023_v38, %v923_v42 }
 0x1c4   : > { %v1245_v16 = vadd.f32 %v1213_v0, %v1148_v44  ;;  %v1214_v23 = vmul.f32 %v1471_v37, %v2623_v17  ;;  %v2224_v44 = vld [vmem:[%s2374_s16 + $0x48] sm:$0xff] }
 0x1c5   : > { %2181 = vmatmul.msk.f32.gmra.mxu3 %vm518_vm0, %v1756_v19  ;;  %v1436_v19 = vadd.f32 %v1404_v1, %v1339_v12  ;;  %v1727_v53 = vadd.f32 %v1695_v63, %v1630_v6  ;;  %v1020_v12 = vmul.f32 %v1566_v22, %v2590_v62  ;;  %v1504_v63 = vmul.f32 %v2654_v41, %v1471_v37 }
 0x1c6   : > { %v1900_v21 = vpop.f32.mrf.mxu1  ;;  %v1601_v22 = vmul.f32 %v2664_v56, %v1568_v60  ;;  %v1342_v54 = vadd.f32 %v1310_v3, %v1245_v16  ;;  %v1667_v3 = vld [vmem:[#allocation2 + $0x19a] sm:$0xff] }
 0x1c7   : > { %v1901_v18 = vadd.f32 %v3080_v5, %v1900_v21  ;;  %v1340_v21 = vadd.f32 %v1308_v9, %v1243_v40  ;;  %v1759_v15 = vmax.f32 %v1727_v53, 0.0  ;;  %v1438_v40 = vadd.f32 %v1406_v29, %v1341_v25  ;;  %v1472_v53 = vld [vmem:[#allocation2 + $0x188] sm:$0xff]  ;;  %v1473_v25 = vld [vmem:[#allocation2 + $0x198] sm:$0xff] }
 0x1c8   : > { %v1052_v6 = vadd.f32 %v1020_v12, %v955_v13  ;;  %v1215_v42 = vmul.f32 %v1472_v53, %v2623_v17  ;;  %v1570_v17 = vld [vmem:[#allocation2 + $0x199] sm:$0xff] }
 0x1c9   : > { %v1988_v2 = vadd.f32 %v2219_v26, %v1901_v18  ;;  %v1534_v18 = vadd.f32 %v1502_v28, %v1436_v19  ;;  %v1437_v59 = vadd.f32 %v1405_v36, %v1340_v21  ;;  %v1117_v19 = vmul.f32 %v1663_v58, %v2607_v7 }
 0x1ca   : > { %v924_v28 = vmul.f32 %v1470_v24, %v2571_v57  ;;  %v1407_v36 = vmul.f32 %v1664_v39, %v2646_v32  ;;  %v1536_v21 = vadd.f32 %v1504_v63, %v1438_v40  ;;  %v1603_v63 = vmul.f32 %v2664_v56, %v1570_v17  ;;  %v2234_v17 = vld [vmem:[%s2374_s16 + $0x98] sm:$0xff] }
 0x1cb   : > { %2020 = vst.msk [vmem:[%s3097_s18 + $0x20] sm:$0xff] %vm518_vm0, %v1988_v2  ;;  %v1503_v2 = vmul.f32 %v2654_v41, %v1470_v24  ;;  %v1021_v24 = vmul.f32 %v1567_v27, %v2590_v62 }
 0x1cc   : > { %v956_v57 = vadd.f32 %v3023_v38, %v924_v28  ;;  %v1439_v47 = vadd.f32 %v1407_v36, %v1342_v54  ;;  %v1118_v38 = vmul.f32 %v1664_v39, %v2607_v7 }
 0x1cd   : > { %2182 = vmatmul.msk.f32.gmra.mxu3 %vm518_vm0, %v1757_v8  ;;  %v1631_v8 = vadd.f32 %v1599_v48, %v1534_v18  ;;  %v1149_v18 = vadd.f32 %v1117_v19, %v1052_v6  ;;  %v2223_v48 = vld [vmem:[%s2374_s16 + $0x40] sm:$0xff]  ;;  %v2225_v6 = vld [vmem:[%s2374_s16 + $0x50] sm:$0xff] }
 0x1ce   : > { %v1903_v46 = vpop.f32.mrf.mxu1 }
 0x1cf   : > { %v1904_v31 = vadd.f32 %v3080_v5, %v1903_v46  ;;  %v1535_v46 = vadd.f32 %v1503_v2, %v1437_v59  ;;  %v1728_v51 = vadd.f32 %v1696_v35, %v1631_v8  ;;  %v1633_v2 = vadd.f32 %v1601_v22, %v1536_v21 }
 0x1d0   : > { %v1505_v59 = vmul.f32 %v2654_v41, %v1472_v53  ;;  %v1246_v43 = vadd.f32 %v1214_v23, %v1149_v18  ;;  %v1602_v8 = vmul.f32 %v2664_v56, %v1569_v33  ;;  %v1408_v35 = vmul.f32 %v1665_v10, %v2646_v32  ;;  %v2226_v53 = vld [vmem:[%s2374_s16 + $0x58] sm:$0xff] }
 0x1d1   : > { %v1989_v61 = vadd.f32 %v2220_v50, %v1904_v31  ;;  %v1632_v9 = vadd.f32 %v1600_v34, %v1535_v46  ;;  %v1700_v22 = vmul.f32 %v3072_v52, %v1667_v3 }
 0x1d2   : > { %v1537_v27 = vadd.f32 %v1505_v59, %v1439_v47  ;;  %v1343_v46 = vadd.f32 %v1311_v49, %v1246_v43  ;;  %v2228_v59 = vld [vmem:[%s2374_s16 + $0x68] sm:$0xff] }
 0x1d3   : > { %2021 = vst.msk [vmem:[%s3097_s18 + $0x28] sm:$0xff] %vm518_vm0, %v1989_v61  ;;  %v1697_v61 = vmul.f32 %v3072_v52, %v1664_v39 }
 0x1d4   : > { %v1634_v39 = vadd.f32 %v1602_v8, %v1537_v27  ;;  %v1440_v13 = vadd.f32 %v1408_v35, %v1343_v46  ;;  %v2230_v8 = vld [vmem:[%s2374_s16 + $0x80] sm:$0xff] }
 0x1d5   : > { %2183 = vmatmul.msk.f32.gmra.mxu3 %vm518_vm0, %v1758_v4  ;;  %v1760_v4 = vmax.f32 %v1728_v51, 0.0 }
 0x1d6   : > { %v1906_v11 = vpop.f32.mrf.mxu1 }
 0x1d7   : > { %v1907_v14 = vadd.f32 %v3080_v5, %v1906_v11  ;;  %v1729_v11 = vadd.f32 %v1697_v61, %v1632_v9 }
 0x1d9   : > { %v1990_v26 = vadd.f32 %v2221_v55, %v1907_v14  ;;  %v1698_v55 = vmul.f32 %v3072_v52, %v1665_v10 }
 0x1db   : > { %2022 = vst.msk [vmem:[%s3097_s18 + $0x30] sm:$0xff] %vm518_vm0, %v1990_v26  ;;  %v1761_v26 = vmax.f32 %v1729_v11, 0.0  ;;  %v1730_v29 = vadd.f32 %v1698_v55, %v1633_v2  ;;  %v1571_v11 = vld [vmem:[#allocation2 + $0x1a1] sm:$0xff] }
 0x1dc   : > { %v1604_v23 = vmul.f32 %v2664_v56, %v1571_v11 }
 0x1dd   : > { %2184 = vmatmul.msk.f32.gmra.mxu3 %vm518_vm0, %v1759_v15  ;;  %v1053_v15 = vadd.f32 %v1021_v24, %v956_v57  ;;  %v1762_v51 = vmax.f32 %v1730_v29, 0.0 }
 0x1de   : > { %v1909_v1 = vpop.f32.mrf.mxu1 }
 0x1df   : > { %v1910_v31 = vadd.f32 %v3080_v5, %v1909_v1  ;;  %v1666_v1 = vld [vmem:[#allocation2 + $0x18a] sm:$0xff]  ;;  %v1150_v37 = vadd.f32 %v1118_v38, %v1053_v15 }
 0x1e0   : > { %v1699_v0 = vmul.f32 %v3072_v52, %v1666_v1  ;;  %v1409_v16 = vmul.f32 %v1666_v1, %v2646_v32  ;;  %v2229_v38 = vld [vmem:[%s2374_s16 + $0x70] sm:$0xff]  ;;  %v2231_v1 = vld [vmem:[%s2374_s16 + $0x78] sm:$0xff] }
 0x1e1   : > { %v1991_v50 = vadd.f32 %v2222_v45, %v1910_v31  ;;  %v1506_v31 = vmul.f32 %v2654_v41, %v1473_v25  ;;  %v1247_v12 = vadd.f32 %v1215_v42, %v1150_v37  ;;  %v1312_v45 = vmul.f32 %v1569_v33, %v2643_v30  ;;  %v2232_v37 = vld [vmem:[%s2374_s16 + $0x88] sm:$0xff] }
 0x1e2   : > { %v1731_v61 = vadd.f32 %v1699_v0, %v1634_v39  ;;  %v2233_v0 = vld [vmem:[%s2374_s16 + $0x90] sm:$0xff] }
 0x1e3   : > { %2023 = vst.msk [vmem:[%s3097_s18 + $0x38] sm:$0xff] %vm518_vm0, %v1991_v50  ;;  %v1538_v40 = vadd.f32 %v1506_v31, %v1440_v13  ;;  %v1344_v60 = vadd.f32 %v1312_v45, %v1247_v12 }
 0x1e4   : > { %v1763_v28 = vmax.f32 %v1731_v61, 0.0  ;;  %v2235_v61 = vld [vmem:[%s2374_s16 + $0xa0] sm:$0xff] }
 0x1e5   : > { %2185 = vmatmul.msk.f32.gmra.mxu3 %vm518_vm0, %v1760_v4  ;;  %v1474_v4 = vld [vmem:[#allocation2 + $0x1a0] sm:$0xff]  ;;  %v1635_v30 = vadd.f32 %v1603_v63, %v1538_v40  ;;  %v1441_v36 = vadd.f32 %v1409_v16, %v1344_v60  ;;  %v2236_v60 = vld [vmem:[%s2374_s16 + $0xa8] sm:$0xff] }
 0x1e6   : > { %v1912_v20 = vpop.f32.mrf.mxu1 }
 0x1e7   : > { %v1913_v14 = vadd.f32 %v3080_v5, %v1912_v20  ;;  %v1507_v20 = vmul.f32 %v2654_v41, %v1474_v4  ;;  %v1732_v10 = vadd.f32 %v1700_v22, %v1635_v30  ;;  %v2238_v22 = vld [vmem:[%s2374_s16 + $0xb8] sm:$0xff] }
 0x1e9   : > { %v1992_v58 = vadd.f32 %v2223_v48, %v1913_v14  ;;  %v1539_v54 = vadd.f32 %v1507_v20, %v1441_v36  ;;  %v1668_v14 = vld [vmem:[#allocation2 + $0x1a2] sm:$0xff]  ;;  %v1764_v57 = vmax.f32 %v1732_v10, 0.0 }
 0x1ea   : > { %v1701_v24 = vmul.f32 %v3072_v52, %v1668_v14 }
 0x1eb   : > { %2024 = vst.msk [vmem:[%s3097_s18 + $0x40] sm:$0xff] %vm518_vm0, %v1992_v58  ;;  %v1636_v41 = vadd.f32 %v1604_v23, %v1539_v54  ;;  %v2240_v23 = vld [vmem:[%s2374_s16 + $0xc8] sm:$0xff] }
 0x1ed   : > { %2186 = vmatmul.msk.f32.gmra.mxu3 %vm518_vm0, %v1761_v26  ;;  %v1733_v55 = vadd.f32 %v1701_v24, %v1636_v41  ;;  %v2227_v26 = vld [vmem:[%s2374_s16 + $0x60] sm:$0xff] }
 0x1ee   : > { %v1915_v62 = vpop.f32.mrf.mxu1 }
 0x1ef   : > { %v1916_v34 = vadd.f32 %v3080_v5, %v1915_v62  ;;  %v1765_v2 = vmax.f32 %v1733_v55, 0.0 }
 0x1f1   : > { %v1993_v7 = vadd.f32 %v2224_v44, %v1916_v34 }
 0x1f3   : > { %2025 = vst.msk [vmem:[%s3097_s18 + $0x48] sm:$0xff] %vm518_vm0, %v1993_v7 }
 0x1f5   : > { %2187 = vmatmul.msk.f32.gmra.mxu3 %vm518_vm0, %v1762_v51 }
 0x1f6   : > { %v1918_v50 = vpop.f32.mrf.mxu1 }
 0x1f7   : > { %v1919_v9 = vadd.f32 %v3080_v5, %v1918_v50 }
 0x1f9   : > { %v1994_v19 = vadd.f32 %v2225_v6, %v1919_v9  ;;  %v2237_v6 = vld [vmem:[%s2374_s16 + $0xb0] sm:$0xff] }
 0x1fb   : > { %2026 = vst.msk [vmem:[%s3097_s18 + $0x50] sm:$0xff] %vm518_vm0, %v1994_v19 }
 0x1fd   : > { %2188 = vmatmul.msk.f32.gmra.mxu3 %vm518_vm0, %v1763_v28 }
 0x1fe   : > { %v1921_v21 = vpop.f32.mrf.mxu1 }
 0x1ff   : > { %v1922_v32 = vadd.f32 %v3080_v5, %v1921_v21  ;;  %v2239_v21 = vld [vmem:[%s2374_s16 + $0xc0] sm:$0xff] }
 0x201   : > { %v1995_v18 = vadd.f32 %v2226_v53, %v1922_v32 }
 0x203   : > { %2027 = vst.msk [vmem:[%s3097_s18 + $0x58] sm:$0xff] %vm518_vm0, %v1995_v18 }
 0x205   : > { %2189 = vmatmul.msk.f32.gmra.mxu3 %vm518_vm0, %v1764_v57  ;;  %v2241_v57 = vld [vmem:[%s2374_s16 + $0xd0] sm:$0xff] }
 0x206   : > { %v1924_v48 = vpop.f32.mrf.mxu1 }
 0x207   : > { %v1925_v58 = vadd.f32 %v3080_v5, %v1924_v48 }
 0x209   : > { %v1996_v56 = vadd.f32 %v2227_v26, %v1925_v58  ;;  %v2242_v58 = vld [vmem:[%s2374_s16 + $0xd8] sm:$0xff] }
 0x20b   : > { %2028 = vst.msk [vmem:[%s3097_s18 + $0x60] sm:$0xff] %vm518_vm0, %v1996_v56 }
 0x20d   : > { %2190 = vmatmul.msk.f32.gmra.mxu3 %vm518_vm0, %v1765_v2  ;;  %v2243_v2 = vld [vmem:[%s2374_s16 + $0xe0] sm:$0xff] }
 0x20e   : > { %v1927_v47 = vpop.f32.mrf.mxu1 }
 0x20f   : > { %v1928_v52 = vadd.f32 %v3080_v5, %v1927_v47 }
 0x211   : > { %v1997_v33 = vadd.f32 %v2228_v59, %v1928_v52 }
 0x213   : > { %2029 = vst.msk [vmem:[%s3097_s18 + $0x68] sm:$0xff] %vm518_vm0, %v1997_v33  ;;  %v2244_v33 = vld [vmem:[%s2374_s16 + $0xe8] sm:$0xff] }
 0x216   : > { %v1930_v43 = vpop.f32.mrf.mxu1 }
 0x217   : > { %v1931_v49 = vadd.f32 %v3080_v5, %v1930_v43 }
 0x218   : > { %v1936_v15 = vpop.f32.mrf.mxu3 }
 0x219   : > { %v1998_v62 = vadd.f32 %v2229_v38, %v1931_v49  ;;  %v1937_v27 = vadd.f32 %v3080_v5, %v1936_v15  ;;  %v2245_v38 = vld [vmem:[%s2374_s16 + $0xf0] sm:$0xff] }
 0x21b   : > { %2030 = vst.msk [vmem:[%s3097_s18 + $0x70] sm:$0xff] %vm518_vm0, %v1998_v62  ;;  %v2000_v35 = vadd.f32 %v2230_v8, %v1937_v27 }
 0x21d   : > { %2032 = vst.msk [vmem:[%s3097_s18 + $0x80] sm:$0xff] %vm518_vm0, %v2000_v35  ;;  %v2246_v35 = vld [vmem:[%s2374_s16 + $0xf8] sm:$0xff] }
 0x21e   : > { %v1933_v42 = vpop.f32.mrf.mxu1 }
 0x21f   : > { %v1934_v34 = vadd.f32 %v3080_v5, %v1933_v42 }
 0x220   : > { %v1939_v29 = vpop.f32.mrf.mxu3 }
 0x221   : > { %v1999_v46 = vadd.f32 %v2231_v1, %v1934_v34  ;;  %v1940_v25 = vadd.f32 %v3080_v5, %v1939_v29 }
 0x223   : > { %2031 = vst.msk [vmem:[%s3097_s18 + $0x78] sm:$0xff] %vm518_vm0, %v1999_v46  ;;  %v2001_v44 = vadd.f32 %v2232_v37, %v1940_v25 }
 0x225   : > { %2033 = vst.msk [vmem:[%s3097_s18 + $0x88] sm:$0xff] %vm518_vm0, %v2001_v44 }
 0x228   : > { %v1942_v7 = vpop.f32.mrf.mxu3 }
 0x229   : > { %v1943_v39 = vadd.f32 %v3080_v5, %v1942_v7 }
 0x22b   : > { %v2002_v31 = vadd.f32 %v2233_v0, %v1943_v39 }
 0x22d   : > { %2034 = vst.msk [vmem:[%s3097_s18 + $0x90] sm:$0xff] %vm518_vm0, %v2002_v31 }
 0x230   : > { %v1945_v51 = vpop.f32.mrf.mxu3 }
 0x231   : > { %v1946_v13 = vadd.f32 %v3080_v5, %v1945_v51 }
 0x233   : > { %v2003_v12 = vadd.f32 %v2234_v17, %v1946_v13 }
 0x235   : > { %2035 = vst.msk [vmem:[%s3097_s18 + $0x98] sm:$0xff] %vm518_vm0, %v2003_v12 }
 0x238   : > { %v1948_v45 = vpop.f32.mrf.mxu3 }
 0x239   : > { %v1949_v50 = vadd.f32 %v3080_v5, %v1948_v45 }
 0x23b   : > { %v2004_v63 = vadd.f32 %v2235_v61, %v1949_v50 }
 0x23d   : > { %2036 = vst.msk [vmem:[%s3097_s18 + $0xa0] sm:$0xff] %vm518_vm0, %v2004_v63 }
 0x240   : > { %v1951_v9 = vpop.f32.mrf.mxu3 }
 0x241   : > { %v1952_v40 = vadd.f32 %v3080_v5, %v1951_v9 }
 0x243   : > { %v2005_v16 = vadd.f32 %v2236_v60, %v1952_v40 }
 0x245   : > { %2037 = vst.msk [vmem:[%s3097_s18 + $0xa8] sm:$0xff] %vm518_vm0, %v2005_v16 }
 0x248   : > { %v1954_v3 = vpop.f32.mrf.mxu3 }
 0x249   : > { %v1955_v4 = vadd.f32 %v3080_v5, %v1954_v3 }
 0x24b   : > { %v2006_v19 = vadd.f32 %v2237_v6, %v1955_v4 }
 0x24d   : > { %2038 = vst.msk [vmem:[%s3097_s18 + $0xb0] sm:$0xff] %vm518_vm0, %v2006_v19 }
 0x250   : > { %v1957_v28 = vpop.f32.mrf.mxu3 }
 0x251   : > { %v1958_v30 = vadd.f32 %v3080_v5, %v1957_v28 }
 0x253   : > { %v2007_v36 = vadd.f32 %v2238_v22, %v1958_v30 }
 0x255   : > { %2039 = vst.msk [vmem:[%s3097_s18 + $0xb8] sm:$0xff] %vm518_vm0, %v2007_v36 }
 0x258   : > { %v1960_v20 = vpop.f32.mrf.mxu3 }
 0x259   : > { %v1961_v11 = vadd.f32 %v3080_v5, %v1960_v20 }
 0x25b   : > { %v2008_v32 = vadd.f32 %v2239_v21, %v1961_v11 }
 0x25d   : > { %2040 = vst.msk [vmem:[%s3097_s18 + $0xc0] sm:$0xff] %vm518_vm0, %v2008_v32 }
 0x260   : > { %v1963_v10 = vpop.f32.mrf.mxu3 }
 0x261   : > { %v1964_v54 = vadd.f32 %v3080_v5, %v1963_v10 }
 0x263   : > { %v2009_v14 = vadd.f32 %v2240_v23, %v1964_v54 }
 0x265   : > { %2041 = vst.msk [vmem:[%s3097_s18 + $0xc8] sm:$0xff] %vm518_vm0, %v2009_v14 }
 0x268   : > { %v1966_v53 = vpop.f32.mrf.mxu3 }
 0x269   : > { %v1967_v18 = vadd.f32 %v3080_v5, %v1966_v53 }
 0x26b   : > { %v2010_v41 = vadd.f32 %v2241_v57, %v1967_v18 }
 0x26d   : > { %2042 = vst.msk [vmem:[%s3097_s18 + $0xd0] sm:$0xff] %vm518_vm0, %v2010_v41 }
 0x270   : > { %v1969_v24 = vpop.f32.mrf.mxu3 }
 0x271   : > { %v1970_v48 = vadd.f32 %v3080_v5, %v1969_v24 }
 0x273   : > { %v2011_v55 = vadd.f32 %v2242_v58, %v1970_v48 }
 0x275   : > { %2043 = vst.msk [vmem:[%s3097_s18 + $0xd8] sm:$0xff] %vm518_vm0, %v2011_v55 }
 0x278   : > { %v1972_v26 = vpop.f32.mrf.mxu3 }
 0x279   : > { %v1973_v56 = vadd.f32 %v3080_v5, %v1972_v26 }
 0x27b   : > { %v2012_v47 = vadd.f32 %v2243_v2, %v1973_v56 }
 0x27d   : > { %2044 = vst.msk [vmem:[%s3097_s18 + $0xe0] sm:$0xff] %vm518_vm0, %v2012_v47 }
 0x280   : > { %v1975_v52 = vpop.f32.mrf.mxu3 }
 0x281   : > { %v1976_v59 = vadd.f32 %v3080_v5, %v1975_v52 }
 0x283   : > { %v2013_v43 = vadd.f32 %v2244_v33, %v1976_v59 }
 0x285   : > { %2045 = vst.msk [vmem:[%s3097_s18 + $0xe8] sm:$0xff] %vm518_vm0, %v2013_v43 }
 0x288   : > { %v1978_v49 = vpop.f32.mrf.mxu3 }
 0x289   : > { %v1979_v15 = vadd.f32 %v3080_v5, %v1978_v49 }
 0x28b   : > { %v2014_v62 = vadd.f32 %v2245_v38, %v1979_v15 }
 0x28d   : > { %2046 = vst.msk [vmem:[%s3097_s18 + $0xf0] sm:$0xff] %vm518_vm0, %v2014_v62 }
 0x290   : > { %v1981_v27 = vpop.f32.mrf.mxu3 }
 0x291   : > { %v1982_v8 = vadd.f32 %v3080_v5, %v1981_v27 }
 0x293   : > { %v2015_v42 = vadd.f32 %v2246_v35, %v1982_v8 }
 0x295   : > { %2047 = vst.msk [vmem:[%s3097_s18 + $0xf8] sm:$0xff] %vm518_vm0, %v2015_v42 }
 0x296 PF: > { %s18_s27 = sadd.s32 1, %s2253_s27  }
 0x297   : > { %p15_p4 = scmp.ge.s32.totalorder %s18_s27, 4  }
 0x299   :  { %17 = sbr.rel (!%p15_p4) target bundleno = 1 (0x1), region = 87 }

</bundles_post_ra>
